<compile_context>
chip_gen: v7x
topology: tpu7x:2x2x1
jax: 0.10.0
libtpu: 0.0.40
codegen_flags: <defaults>
</compile_context>

<pallas_src>
import jax
import jax.numpy as jnp
import numpy as np
from jax.experimental import pallas as pl
from jax.experimental.pallas import tpu as pltpu


# ---------------------------------------------------------------------------
# Init-time weight preprocessing (hoisted out of the forward path).
# ---------------------------------------------------------------------------
def _conv_band_matrices(w, w_in):
    """Lower a kxk 'valid' conv to row-shifted banded matmuls.

    Feature maps use the 2-D layout X[y, x*C + c] (rows on sublanes,
    width*channels on lanes).  Then

        conv_out[y, x*outC + o] = ( sum_i X[i:i+Ho, :] @ M_i )[y, x*outC + o]

    with M_i[(x+j)*C + c, x*outC + o] = w[o, c, i, j] (OIHW weights).
    Returns M of shape (kh, w_in*C, Wo*outC).
    """
    w = np.asarray(w, np.float32)
    out_c, c_in, kh, kw = w.shape
    wo = w_in - kw + 1
    m = np.zeros((kh, w_in * c_in, wo * out_c), np.float32)
    wt = np.transpose(w, (2, 3, 1, 0))                     # (kh, kw, C, outC)
    for x in range(wo):
        for j in range(kw):
            m[:, (x + j) * c_in:(x + j + 1) * c_in,
              x * out_c:(x + 1) * out_c] = wt[:, j]
    return jnp.asarray(m)


def _pool_matrices(h_in, w_in, c):
    """2x2 average pooling as  Q @ Y @ P  on the [y, x*C + c] layout."""
    ho, wo = h_in // 2, w_in // 2
    q = np.zeros((ho, h_in), np.float32)
    q[np.arange(h_in) // 2, np.arange(h_in)] = 0.5
    p = np.zeros((w_in * c, wo * c), np.float32)
    cols = np.arange(w_in * c)
    p[cols, (cols // (2 * c)) * c + cols % c] = 0.5
    return jnp.asarray(q), jnp.asarray(p)


def _tile_bias(b, reps):
    """Bias laid out to match the [y, x*C + c] lane layout: tile(b, reps)."""
    return jnp.asarray(np.tile(np.asarray(b, np.float32), reps)[None, :])


def pack_params(p):
    """Precompute all kernel-ready (banded / pooling / transposed / tiled) tensors."""
    q1, p1 = _pool_matrices(28, 28, 6)
    q2, p2 = _pool_matrices(10, 10, 16)
    return {
        "m1": _conv_band_matrices(p["c1_w"], 32),   # (5, 32, 168)
        "b1": _tile_bias(p["c1_b"], 28),            # (1, 168)
        "q1": q1, "p1": p1,                         # (14, 28), (168, 84)
        "m3": _conv_band_matrices(p["c3_w"], 14),   # (5, 84, 160)
        "b3": _tile_bias(p["c3_b"], 10),            # (1, 160)
        "q2": q2, "p2": p2,                         # (5, 10), (160, 80)
        "m5": _conv_band_matrices(p["c5_w"], 5),    # (5, 80, 120)
        "b5": _tile_bias(p["c5_b"], 1),             # (1, 120)
        "wf1": jnp.asarray(np.asarray(p["fc1_w"], np.float32).T),   # (120, 84)
        "bf1": _tile_bias(p["fc1_b"], 1),           # (1, 84)
        "w2m": jnp.asarray(np.asarray(p["fc2m_w"], np.float32).T),  # (84, 20)
        "b2m": _tile_bias(p["fc2m_b"], 1),          # (1, 20)
        "w2s": jnp.asarray(np.asarray(p["fc2s_w"], np.float32).T),  # (84, 20)
        "b2s": _tile_bias(p["fc2s_b"], 1),          # (1, 20)
    }


# ---------------------------------------------------------------------------
# The single fused Pallas kernel: whole forward pass, everything in VMEM.
# ---------------------------------------------------------------------------
def _lenet5_kernel(x_ref, s_ref,
                   m1_ref, b1_ref, q1_ref, p1_ref,
                   m3_ref, b3_ref, q2_ref, p2_ref,
                   m5_ref, b5_ref,
                   wf1_ref, bf1_ref, w2m_ref, b2m_ref, w2s_ref, b2s_ref,
                   out_ref):
    f32 = jnp.float32
    x = x_ref[...]                                           # (32, 32) padded image

    # --- c1: 5x5 conv as 5 banded matmuls -> (28, 168) layout [y, x*6 + o] ---
    acc1 = jnp.zeros((28, 168), f32)
    for i in range(5):
        acc1 = acc1 + jnp.dot(x[i:i + 28, :], m1_ref[i], preferred_element_type=f32)
    acc1 = acc1 + b1_ref[...]

    # --- s2: 2x2 avg pool (Q1 @ . @ P1) + tanh -> (14, 84) ---
    h1 = jnp.dot(jnp.dot(q1_ref[...], acc1, preferred_element_type=f32),
                 p1_ref[...], preferred_element_type=f32)
    h1 = jnp.tanh(h1)

    # --- c3: conv -> (10, 160) layout [y, x*16 + o] ---
    acc3 = jnp.zeros((10, 160), f32)
    for i in range(5):
        acc3 = acc3 + jnp.dot(h1[i:i + 10, :], m3_ref[i], preferred_element_type=f32)
    acc3 = acc3 + b3_ref[...]

    # --- s4: 2x2 avg pool -> (5, 80) ---
    h2 = jnp.dot(jnp.dot(q2_ref[...], acc3, preferred_element_type=f32),
                 p2_ref[...], preferred_element_type=f32)

    # --- c5: 5x5 conv (output 1x1) -> (1, 120) ---
    acc5 = jnp.zeros((1, 120), f32)
    for i in range(5):
        acc5 = acc5 + jnp.dot(h2[i:i + 1, :], m5_ref[i], preferred_element_type=f32)
    h0 = acc5 + b5_ref[...]

    # --- fc1 + tanh -> (1, 84) ---
    hf = jnp.tanh(jnp.dot(h0, wf1_ref[...], preferred_element_type=f32) + bf1_ref[...])

    # --- fc2_mean / fc2_std -> (1, 20) each ---
    mean = jnp.dot(hf, w2m_ref[...], preferred_element_type=f32) + b2m_ref[...]
    logv = jnp.dot(hf, w2s_ref[...], preferred_element_type=f32) + b2s_ref[...]

    # --- reparameterize: sample * exp(0.5*logvar) + mean ---
    samp = s_ref[...] * jnp.exp(0.5 * logv) + mean

    out_ref[...] = jnp.concatenate([samp, mean, logv], axis=0)   # (3, 20)


def lenet5_forward(kparams, inputs, sample):
    """Mirrors LeNet5.forward. inputs: (1,1,28,28); sample: (20,)."""
    # p0: ConstantPad2d(2, 0) on the last two dims, then view(1, 1, 32, 32).
    x = inputs.astype(jnp.float32)
    pad_spec = [(0, 0)] * (x.ndim - 2) + [(2, 2), (2, 2)]
    x = jnp.pad(x, pad_spec).reshape(32, 32)
    s = sample.astype(jnp.float32).reshape(1, 20)

    out = pl.pallas_call(
        _lenet5_kernel,
        out_shape=jax.ShapeDtypeStruct((3, 20), jnp.float32),
        in_specs=[pl.BlockSpec(memory_space=pltpu.MemorySpace.VMEM)] * 18,
        out_specs=pl.BlockSpec(memory_space=pltpu.MemorySpace.VMEM),
    )(x, s,
      kparams["m1"], kparams["b1"], kparams["q1"], kparams["p1"],
      kparams["m3"], kparams["b3"], kparams["q2"], kparams["p2"],
      kparams["m5"], kparams["b5"],
      kparams["wf1"], kparams["bf1"],
      kparams["w2m"], kparams["b2m"], kparams["w2s"], kparams["b2s"])
    return out[0], out[1], out[2]


# ---------------------------------------------------------------------------
# Parameters (deterministic, PyTorch-like uniform(-1/sqrt(fan_in), ...))
# ---------------------------------------------------------------------------
def init_params(key):
    def uinit(k, shape, fan_in):
        bound = 1.0 / np.sqrt(fan_in)
        return jax.random.uniform(k, shape, jnp.float32, -bound, bound)

    ks = jax.random.split(key, 12)
    return {
        "c1_w": uinit(ks[0], (6, 1, 5, 5), 1 * 5 * 5),
        "c1_b": uinit(ks[1], (6,), 1 * 5 * 5),
        "c3_w": uinit(ks[2], (16, 6, 5, 5), 6 * 5 * 5),
        "c3_b": uinit(ks[3], (16,), 6 * 5 * 5),
        "c5_w": uinit(ks[4], (120, 16, 5, 5), 16 * 5 * 5),
        "c5_b": uinit(ks[5], (120,), 16 * 5 * 5),
        "fc1_w": uinit(ks[6], (84, 120), 120),
        "fc1_b": uinit(ks[7], (84,), 120),
        "fc2m_w": uinit(ks[8], (20, 84), 84),
        "fc2m_b": uinit(ks[9], (20,), 84),
        "fc2s_w": uinit(ks[10], (20, 84), 84),
        "fc2s_b": uinit(ks[11], (20,), 84),
    }


# ---------------------------------------------------------------------------
# Pure-JAX reference (sanity check only)
# ---------------------------------------------------------------------------
def lenet5_reference(params, inputs, sample):
    pad_spec = [(0, 0)] * (inputs.ndim - 2) + [(2, 2), (2, 2)]
    x = jnp.pad(inputs, pad_spec).reshape(1, 1, 32, 32)

    def conv(x, w, b):
        y = jax.lax.conv_general_dilated(
            x, w, (1, 1), "VALID",
            dimension_numbers=("NCHW", "OIHW", "NCHW"),
            precision=jax.lax.Precision.HIGHEST)
        return y + b.reshape(1, -1, 1, 1)

    def pool(x):
        return jax.lax.reduce_window(x, 0.0, jax.lax.add,
                                     (1, 1, 2, 2), (1, 1, 2, 2), "VALID") / 4.0

    x = conv(x, params["c1_w"], params["c1_b"])
    x = jnp.tanh(pool(x))
    x = conv(x, params["c3_w"], params["c3_b"])
    x = pool(x)
    x = conv(x, params["c5_w"], params["c5_b"])
    h = x.reshape(-1)
    h = jnp.tanh(jnp.dot(params["fc1_w"], h, precision=jax.lax.Precision.HIGHEST)
                 + params["fc1_b"])
    mean = jnp.dot(params["fc2m_w"], h, precision=jax.lax.Precision.HIGHEST) + params["fc2m_b"]
    logvar = jnp.dot(params["fc2s_w"], h, precision=jax.lax.Precision.HIGHEST) + params["fc2s_b"]
    samp = sample * jnp.exp(0.5 * logvar) + mean
    return samp, mean, logvar


if __name__ == "__main__":
    key = jax.random.PRNGKey(0)
    k_in, k_s, k_p = jax.random.split(key, 3)

    # Shapes implied by the module: a single 1x28x28 image (pad(2) -> 32x32),
    # `sample` matches the fc2_* output size (20,).
    inputs = jax.random.normal(k_in, (1, 1, 28, 28), jnp.float32)
    sample = jax.random.normal(k_s, (20,), jnp.float32)
    params = init_params(k_p)
    kparams = pack_params(params)          # one-time weight pre-layout

    fwd = jax.jit(lenet5_forward)
    samp, mean, logvar = jax.block_until_ready(fwd(kparams, inputs, sample))

    assert samp.shape == (20,) and mean.shape == (20,) and logvar.shape == (20,)
    assert bool(jnp.all(jnp.isfinite(samp)))

    ref_s, ref_m, ref_lv = lenet5_reference(params, inputs, sample)
    np.testing.assert_allclose(np.asarray(samp), np.asarray(ref_s), rtol=5e-2, atol=5e-2)
    np.testing.assert_allclose(np.asarray(mean), np.asarray(ref_m), rtol=5e-2, atol=5e-2)
    np.testing.assert_allclose(np.asarray(logvar), np.asarray(ref_lv), rtol=5e-2, atol=5e-2)

    print("KERNEL_OK")
</pallas_src>

<mosaic_0001>
module attributes {stable_mosaic.version = 11 : i64} {
  func.func @_lenet5_kernel(%arg0: memref<32x32xf32, #tpu.memory_space<vmem>>, %arg1: memref<1x20xf32, #tpu.memory_space<vmem>>, %arg2: memref<5x32x168xf32, #tpu.memory_space<vmem>>, %arg3: memref<1x168xf32, #tpu.memory_space<vmem>>, %arg4: memref<14x28xf32, #tpu.memory_space<vmem>>, %arg5: memref<168x84xf32, #tpu.memory_space<vmem>>, %arg6: memref<5x84x160xf32, #tpu.memory_space<vmem>>, %arg7: memref<1x160xf32, #tpu.memory_space<vmem>>, %arg8: memref<5x10xf32, #tpu.memory_space<vmem>>, %arg9: memref<160x80xf32, #tpu.memory_space<vmem>>, %arg10: memref<5x80x120xf32, #tpu.memory_space<vmem>>, %arg11: memref<1x120xf32, #tpu.memory_space<vmem>>, %arg12: memref<120x84xf32, #tpu.memory_space<vmem>>, %arg13: memref<1x84xf32, #tpu.memory_space<vmem>>, %arg14: memref<84x20xf32, #tpu.memory_space<vmem>>, %arg15: memref<1x20xf32, #tpu.memory_space<vmem>>, %arg16: memref<84x20xf32, #tpu.memory_space<vmem>>, %arg17: memref<1x20xf32, #tpu.memory_space<vmem>>, %arg18: memref<3x20xf32, #tpu.memory_space<vmem>>) attributes {dimension_semantics = [], scalar_prefetch = 0 : i64, scratch_operands = 0 : i64, tpu.core_type = #tpu.core_type<tc>} {
    %c0 = arith.constant 0 : index
    %c0_0 = arith.constant 0 : index
    %0 = vector.load %arg0[%c0, %c0_0] : memref<32x32xf32, #tpu.memory_space<vmem>>, vector<32x32xf32>
    %cst = arith.constant 0.000000e+00 : f32
    %1 = vector.broadcast %cst : f32 to vector<28x168xf32>
    %2 = vector.extract_strided_slice %0 {offsets = [0, 0], sizes = [28, 32], strides = [1, 1]} : vector<32x32xf32> to vector<28x32xf32>
    %c0_1 = arith.constant 0 : index
    %c0_2 = arith.constant 0 : index
    %c0_3 = arith.constant 0 : index
    %3 = vector.load %arg2[%c0_1, %c0_2, %c0_3] : memref<5x32x168xf32, #tpu.memory_space<vmem>>, vector<1x32x168xf32>
    %4 = vector.shape_cast %3 : vector<1x32x168xf32> to vector<32x168xf32>
    %cst_4 = arith.constant dense<0.000000e+00> : vector<28x168xf32>
    %5 = tpu.matmul %2, %4, %cst_4 {dimension_numbers = #tpu.dot_dimension_numbers<[1], [0], [0], [1], [0, 0, 1, 1], [], []>} : vector<28x32xf32>, vector<32x168xf32>, vector<28x168xf32> -> vector<28x168xf32>
    %6 = arith.addf %1, %5 : vector<28x168xf32>
    %7 = vector.extract_strided_slice %0 {offsets = [1, 0], sizes = [28, 32], strides = [1, 1]} : vector<32x32xf32> to vector<28x32xf32>
    %c1 = arith.constant 1 : index
    %c0_5 = arith.constant 0 : index
    %c0_6 = arith.constant 0 : index
    %8 = vector.load %arg2[%c1, %c0_5, %c0_6] : memref<5x32x168xf32, #tpu.memory_space<vmem>>, vector<1x32x168xf32>
    %9 = vector.shape_cast %8 : vector<1x32x168xf32> to vector<32x168xf32>
    %cst_7 = arith.constant dense<0.000000e+00> : vector<28x168xf32>
    %10 = tpu.matmul %7, %9, %cst_7 {dimension_numbers = #tpu.dot_dimension_numbers<[1], [0], [0], [1], [0, 0, 1, 1], [], []>} : vector<28x32xf32>, vector<32x168xf32>, vector<28x168xf32> -> vector<28x168xf32>
    %11 = arith.addf %6, %10 : vector<28x168xf32>
    %12 = vector.extract_strided_slice %0 {offsets = [2, 0], sizes = [28, 32], strides = [1, 1]} : vector<32x32xf32> to vector<28x32xf32>
    %c2 = arith.constant 2 : index
    %c0_8 = arith.constant 0 : index
    %c0_9 = arith.constant 0 : index
    %13 = vector.load %arg2[%c2, %c0_8, %c0_9] : memref<5x32x168xf32, #tpu.memory_space<vmem>>, vector<1x32x168xf32>
    %14 = vector.shape_cast %13 : vector<1x32x168xf32> to vector<32x168xf32>
    %cst_10 = arith.constant dense<0.000000e+00> : vector<28x168xf32>
    %15 = tpu.matmul %12, %14, %cst_10 {dimension_numbers = #tpu.dot_dimension_numbers<[1], [0], [0], [1], [0, 0, 1, 1], [], []>} : vector<28x32xf32>, vector<32x168xf32>, vector<28x168xf32> -> vector<28x168xf32>
    %16 = arith.addf %11, %15 : vector<28x168xf32>
    %17 = vector.extract_strided_slice %0 {offsets = [3, 0], sizes = [28, 32], strides = [1, 1]} : vector<32x32xf32> to vector<28x32xf32>
    %c3 = arith.constant 3 : index
    %c0_11 = arith.constant 0 : index
    %c0_12 = arith.constant 0 : index
    %18 = vector.load %arg2[%c3, %c0_11, %c0_12] : memref<5x32x168xf32, #tpu.memory_space<vmem>>, vector<1x32x168xf32>
    %19 = vector.shape_cast %18 : vector<1x32x168xf32> to vector<32x168xf32>
    %cst_13 = arith.constant dense<0.000000e+00> : vector<28x168xf32>
    %20 = tpu.matmul %17, %19, %cst_13 {dimension_numbers = #tpu.dot_dimension_numbers<[1], [0], [0], [1], [0, 0, 1, 1], [], []>} : vector<28x32xf32>, vector<32x168xf32>, vector<28x168xf32> -> vector<28x168xf32>
    %21 = arith.addf %16, %20 : vector<28x168xf32>
    %22 = vector.extract_strided_slice %0 {offsets = [4, 0], sizes = [28, 32], strides = [1, 1]} : vector<32x32xf32> to vector<28x32xf32>
    %c4 = arith.constant 4 : index
    %c0_14 = arith.constant 0 : index
    %c0_15 = arith.constant 0 : index
    %23 = vector.load %arg2[%c4, %c0_14, %c0_15] : memref<5x32x168xf32, #tpu.memory_space<vmem>>, vector<1x32x168xf32>
    %24 = vector.shape_cast %23 : vector<1x32x168xf32> to vector<32x168xf32>
    %cst_16 = arith.constant dense<0.000000e+00> : vector<28x168xf32>
    %25 = tpu.matmul %22, %24, %cst_16 {dimension_numbers = #tpu.dot_dimension_numbers<[1], [0], [0], [1], [0, 0, 1, 1], [], []>} : vector<28x32xf32>, vector<32x168xf32>, vector<28x168xf32> -> vector<28x168xf32>
    %26 = arith.addf %21, %25 : vector<28x168xf32>
    %c0_17 = arith.constant 0 : index
    %c0_18 = arith.constant 0 : index
    %27 = vector.load %arg3[%c0_17, %c0_18] : memref<1x168xf32, #tpu.memory_space<vmem>>, vector<1x168xf32>
    %28 = vector.broadcast %27 : vector<1x168xf32> to vector<28x168xf32>
    %29 = arith.addf %26, %28 : vector<28x168xf32>
    %c0_19 = arith.constant 0 : index
    %c0_20 = arith.constant 0 : index
    %30 = vector.load %arg4[%c0_19, %c0_20] : memref<14x28xf32, #tpu.memory_space<vmem>>, vector<14x28xf32>
    %cst_21 = arith.constant dense<0.000000e+00> : vector<14x168xf32>
    %31 = tpu.matmul %30, %29, %cst_21 {dimension_numbers = #tpu.dot_dimension_numbers<[1], [0], [0], [1], [0, 0, 1, 1], [], []>} : vector<14x28xf32>, vector<28x168xf32>, vector<14x168xf32> -> vector<14x168xf32>
    %c0_22 = arith.constant 0 : index
    %c0_23 = arith.constant 0 : index
    %32 = vector.load %arg5[%c0_22, %c0_23] : memref<168x84xf32, #tpu.memory_space<vmem>>, vector<168x84xf32>
    %cst_24 = arith.constant dense<0.000000e+00> : vector<14x84xf32>
    %33 = tpu.matmul %31, %32, %cst_24 {dimension_numbers = #tpu.dot_dimension_numbers<[1], [0], [0], [1], [0, 0, 1, 1], [], []>} : vector<14x168xf32>, vector<168x84xf32>, vector<14x84xf32> -> vector<14x84xf32>
    %34 = math.tanh %33 : vector<14x84xf32>
    %cst_25 = arith.constant 0.000000e+00 : f32
    %35 = vector.broadcast %cst_25 : f32 to vector<10x160xf32>
    %36 = vector.extract_strided_slice %34 {offsets = [0, 0], sizes = [10, 84], strides = [1, 1]} : vector<14x84xf32> to vector<10x84xf32>
    %c0_26 = arith.constant 0 : index
    %c0_27 = arith.constant 0 : index
    %c0_28 = arith.constant 0 : index
    %37 = vector.load %arg6[%c0_26, %c0_27, %c0_28] : memref<5x84x160xf32, #tpu.memory_space<vmem>>, vector<1x84x160xf32>
    %38 = vector.shape_cast %37 : vector<1x84x160xf32> to vector<84x160xf32>
    %cst_29 = arith.constant dense<0.000000e+00> : vector<10x160xf32>
    %39 = tpu.matmul %36, %38, %cst_29 {dimension_numbers = #tpu.dot_dimension_numbers<[1], [0], [0], [1], [0, 0, 1, 1], [], []>} : vector<10x84xf32>, vector<84x160xf32>, vector<10x160xf32> -> vector<10x160xf32>
    %40 = arith.addf %35, %39 : vector<10x160xf32>
    %41 = vector.extract_strided_slice %34 {offsets = [1, 0], sizes = [10, 84], strides = [1, 1]} : vector<14x84xf32> to vector<10x84xf32>
    %c1_30 = arith.constant 1 : index
    %c0_31 = arith.constant 0 : index
    %c0_32 = arith.constant 0 : index
    %42 = vector.load %arg6[%c1_30, %c0_31, %c0_32] : memref<5x84x160xf32, #tpu.memory_space<vmem>>, vector<1x84x160xf32>
    %43 = vector.shape_cast %42 : vector<1x84x160xf32> to vector<84x160xf32>
    %cst_33 = arith.constant dense<0.000000e+00> : vector<10x160xf32>
    %44 = tpu.matmul %41, %43, %cst_33 {dimension_numbers = #tpu.dot_dimension_numbers<[1], [0], [0], [1], [0, 0, 1, 1], [], []>} : vector<10x84xf32>, vector<84x160xf32>, vector<10x160xf32> -> vector<10x160xf32>
    %45 = arith.addf %40, %44 : vector<10x160xf32>
    %46 = vector.extract_strided_slice %34 {offsets = [2, 0], sizes = [10, 84], strides = [1, 1]} : vector<14x84xf32> to vector<10x84xf32>
    %c2_34 = arith.constant 2 : index
    %c0_35 = arith.constant 0 : index
    %c0_36 = arith.constant 0 : index
    %47 = vector.load %arg6[%c2_34, %c0_35, %c0_36] : memref<5x84x160xf32, #tpu.memory_space<vmem>>, vector<1x84x160xf32>
    %48 = vector.shape_cast %47 : vector<1x84x160xf32> to vector<84x160xf32>
    %cst_37 = arith.constant dense<0.000000e+00> : vector<10x160xf32>
    %49 = tpu.matmul %46, %48, %cst_37 {dimension_numbers = #tpu.dot_dimension_numbers<[1], [0], [0], [1], [0, 0, 1, 1], [], []>} : vector<10x84xf32>, vector<84x160xf32>, vector<10x160xf32> -> vector<10x160xf32>
    %50 = arith.addf %45, %49 : vector<10x160xf32>
    %51 = vector.extract_strided_slice %34 {offsets = [3, 0], sizes = [10, 84], strides = [1, 1]} : vector<14x84xf32> to vector<10x84xf32>
    %c3_38 = arith.constant 3 : index
    %c0_39 = arith.constant 0 : index
    %c0_40 = arith.constant 0 : index
    %52 = vector.load %arg6[%c3_38, %c0_39, %c0_40] : memref<5x84x160xf32, #tpu.memory_space<vmem>>, vector<1x84x160xf32>
    %53 = vector.shape_cast %52 : vector<1x84x160xf32> to vector<84x160xf32>
    %cst_41 = arith.constant dense<0.000000e+00> : vector<10x160xf32>
    %54 = tpu.matmul %51, %53, %cst_41 {dimension_numbers = #tpu.dot_dimension_numbers<[1], [0], [0], [1], [0, 0, 1, 1], [], []>} : vector<10x84xf32>, vector<84x160xf32>, vector<10x160xf32> -> vector<10x160xf32>
    %55 = arith.addf %50, %54 : vector<10x160xf32>
    %56 = vector.extract_strided_slice %34 {offsets = [4, 0], sizes = [10, 84], strides = [1, 1]} : vector<14x84xf32> to vector<10x84xf32>
    %c4_42 = arith.constant 4 : index
    %c0_43 = arith.constant 0 : index
    %c0_44 = arith.constant 0 : index
    %57 = vector.load %arg6[%c4_42, %c0_43, %c0_44] : memref<5x84x160xf32, #tpu.memory_space<vmem>>, vector<1x84x160xf32>
    %58 = vector.shape_cast %57 : vector<1x84x160xf32> to vector<84x160xf32>
    %cst_45 = arith.constant dense<0.000000e+00> : vector<10x160xf32>
    %59 = tpu.matmul %56, %58, %cst_45 {dimension_numbers = #tpu.dot_dimension_numbers<[1], [0], [0], [1], [0, 0, 1, 1], [], []>} : vector<10x84xf32>, vector<84x160xf32>, vector<10x160xf32> -> vector<10x160xf32>
    %60 = arith.addf %55, %59 : vector<10x160xf32>
    %c0_46 = arith.constant 0 : index
    %c0_47 = arith.constant 0 : index
    %61 = vector.load %arg7[%c0_46, %c0_47] : memref<1x160xf32, #tpu.memory_space<vmem>>, vector<1x160xf32>
    %62 = vector.broadcast %61 : vector<1x160xf32> to vector<10x160xf32>
    %63 = arith.addf %60, %62 : vector<10x160xf32>
    %c0_48 = arith.constant 0 : index
    %c0_49 = arith.constant 0 : index
    %64 = vector.load %arg8[%c0_48, %c0_49] : memref<5x10xf32, #tpu.memory_space<vmem>>, vector<5x10xf32>
    %cst_50 = arith.constant dense<0.000000e+00> : vector<5x160xf32>
    %65 = tpu.matmul %64, %63, %cst_50 {dimension_numbers = #tpu.dot_dimension_numbers<[1], [0], [0], [1], [0, 0, 1, 1], [], []>} : vector<5x10xf32>, vector<10x160xf32>, vector<5x160xf32> -> vector<5x160xf32>
    %c0_51 = arith.constant 0 : index
    %c0_52 = arith.constant 0 : index
    %66 = vector.load %arg9[%c0_51, %c0_52] : memref<160x80xf32, #tpu.memory_space<vmem>>, vector<160x80xf32>
    %cst_53 = arith.constant dense<0.000000e+00> : vector<5x80xf32>
    %67 = tpu.matmul %65, %66, %cst_53 {dimension_numbers = #tpu.dot_dimension_numbers<[1], [0], [0], [1], [0, 0, 1, 1], [], []>} : vector<5x160xf32>, vector<160x80xf32>, vector<5x80xf32> -> vector<5x80xf32>
    %cst_54 = arith.constant 0.000000e+00 : f32
    %68 = vector.broadcast %cst_54 : f32 to vector<1x120xf32>
    %69 = vector.extract_strided_slice %67 {offsets = [0, 0], sizes = [1, 80], strides = [1, 1]} : vector<5x80xf32> to vector<1x80xf32>
    %c0_55 = arith.constant 0 : index
    %c0_56 = arith.constant 0 : index
    %c0_57 = arith.constant 0 : index
    %70 = vector.load %arg10[%c0_55, %c0_56, %c0_57] : memref<5x80x120xf32, #tpu.memory_space<vmem>>, vector<1x80x120xf32>
    %71 = vector.shape_cast %70 : vector<1x80x120xf32> to vector<80x120xf32>
    %cst_58 = arith.constant dense<0.000000e+00> : vector<1x120xf32>
    %72 = tpu.matmul %69, %71, %cst_58 {dimension_numbers = #tpu.dot_dimension_numbers<[1], [0], [0], [1], [0, 0, 1, 1], [], []>} : vector<1x80xf32>, vector<80x120xf32>, vector<1x120xf32> -> vector<1x120xf32>
    %73 = arith.addf %68, %72 : vector<1x120xf32>
    %74 = vector.extract_strided_slice %67 {offsets = [1, 0], sizes = [1, 80], strides = [1, 1]} : vector<5x80xf32> to vector<1x80xf32>
    %c1_59 = arith.constant 1 : index
    %c0_60 = arith.constant 0 : index
    %c0_61 = arith.constant 0 : index
    %75 = vector.load %arg10[%c1_59, %c0_60, %c0_61] : memref<5x80x120xf32, #tpu.memory_space<vmem>>, vector<1x80x120xf32>
    %76 = vector.shape_cast %75 : vector<1x80x120xf32> to vector<80x120xf32>
    %cst_62 = arith.constant dense<0.000000e+00> : vector<1x120xf32>
    %77 = tpu.matmul %74, %76, %cst_62 {dimension_numbers = #tpu.dot_dimension_numbers<[1], [0], [0], [1], [0, 0, 1, 1], [], []>} : vector<1x80xf32>, vector<80x120xf32>, vector<1x120xf32> -> vector<1x120xf32>
    %78 = arith.addf %73, %77 : vector<1x120xf32>
    %79 = vector.extract_strided_slice %67 {offsets = [2, 0], sizes = [1, 80], strides = [1, 1]} : vector<5x80xf32> to vector<1x80xf32>
    %c2_63 = arith.constant 2 : index
    %c0_64 = arith.constant 0 : index
    %c0_65 = arith.constant 0 : index
    %80 = vector.load %arg10[%c2_63, %c0_64, %c0_65] : memref<5x80x120xf32, #tpu.memory_space<vmem>>, vector<1x80x120xf32>
    %81 = vector.shape_cast %80 : vector<1x80x120xf32> to vector<80x120xf32>
    %cst_66 = arith.constant dense<0.000000e+00> : vector<1x120xf32>
    %82 = tpu.matmul %79, %81, %cst_66 {dimension_numbers = #tpu.dot_dimension_numbers<[1], [0], [0], [1], [0, 0, 1, 1], [], []>} : vector<1x80xf32>, vector<80x120xf32>, vector<1x120xf32> -> vector<1x120xf32>
    %83 = arith.addf %78, %82 : vector<1x120xf32>
    %84 = vector.extract_strided_slice %67 {offsets = [3, 0], sizes = [1, 80], strides = [1, 1]} : vector<5x80xf32> to vector<1x80xf32>
    %c3_67 = arith.constant 3 : index
    %c0_68 = arith.constant 0 : index
    %c0_69 = arith.constant 0 : index
    %85 = vector.load %arg10[%c3_67, %c0_68, %c0_69] : memref<5x80x120xf32, #tpu.memory_space<vmem>>, vector<1x80x120xf32>
    %86 = vector.shape_cast %85 : vector<1x80x120xf32> to vector<80x120xf32>
    %cst_70 = arith.constant dense<0.000000e+00> : vector<1x120xf32>
    %87 = tpu.matmul %84, %86, %cst_70 {dimension_numbers = #tpu.dot_dimension_numbers<[1], [0], [0], [1], [0, 0, 1, 1], [], []>} : vector<1x80xf32>, vector<80x120xf32>, vector<1x120xf32> -> vector<1x120xf32>
    %88 = arith.addf %83, %87 : vector<1x120xf32>
    %89 = vector.extract_strided_slice %67 {offsets = [4, 0], sizes = [1, 80], strides = [1, 1]} : vector<5x80xf32> to vector<1x80xf32>
    %c4_71 = arith.constant 4 : index
    %c0_72 = arith.constant 0 : index
    %c0_73 = arith.constant 0 : index
    %90 = vector.load %arg10[%c4_71, %c0_72, %c0_73] : memref<5x80x120xf32, #tpu.memory_space<vmem>>, vector<1x80x120xf32>
    %91 = vector.shape_cast %90 : vector<1x80x120xf32> to vector<80x120xf32>
    %cst_74 = arith.constant dense<0.000000e+00> : vector<1x120xf32>
    %92 = tpu.matmul %89, %91, %cst_74 {dimension_numbers = #tpu.dot_dimension_numbers<[1], [0], [0], [1], [0, 0, 1, 1], [], []>} : vector<1x80xf32>, vector<80x120xf32>, vector<1x120xf32> -> vector<1x120xf32>
    %93 = arith.addf %88, %92 : vector<1x120xf32>
    %c0_75 = arith.constant 0 : index
    %c0_76 = arith.constant 0 : index
    %94 = vector.load %arg11[%c0_75, %c0_76] : memref<1x120xf32, #tpu.memory_space<vmem>>, vector<1x120xf32>
    %95 = arith.addf %93, %94 : vector<1x120xf32>
    %c0_77 = arith.constant 0 : index
    %c0_78 = arith.constant 0 : index
    %96 = vector.load %arg12[%c0_77, %c0_78] : memref<120x84xf32, #tpu.memory_space<vmem>>, vector<120x84xf32>
    %cst_79 = arith.constant dense<0.000000e+00> : vector<1x84xf32>
    %97 = tpu.matmul %95, %96, %cst_79 {dimension_numbers = #tpu.dot_dimension_numbers<[1], [0], [0], [1], [0, 0, 1, 1], [], []>} : vector<1x120xf32>, vector<120x84xf32>, vector<1x84xf32> -> vector<1x84xf32>
    %c0_80 = arith.constant 0 : index
    %c0_81 = arith.constant 0 : index
    %98 = vector.load %arg13[%c0_80, %c0_81] : memref<1x84xf32, #tpu.memory_space<vmem>>, vector<1x84xf32>
    %99 = arith.addf %97, %98 : vector<1x84xf32>
    %100 = math.tanh %99 : vector<1x84xf32>
    %c0_82 = arith.constant 0 : index
    %c0_83 = arith.constant 0 : index
    %101 = vector.load %arg14[%c0_82, %c0_83] : memref<84x20xf32, #tpu.memory_space<vmem>>, vector<84x20xf32>
    %cst_84 = arith.constant dense<0.000000e+00> : vector<1x20xf32>
    %102 = tpu.matmul %100, %101, %cst_84 {dimension_numbers = #tpu.dot_dimension_numbers<[1], [0], [0], [1], [0, 0, 1, 1], [], []>} : vector<1x84xf32>, vector<84x20xf32>, vector<1x20xf32> -> vector<1x20xf32>
    %c0_85 = arith.constant 0 : index
    %c0_86 = arith.constant 0 : index
    %103 = vector.load %arg15[%c0_85, %c0_86] : memref<1x20xf32, #tpu.memory_space<vmem>>, vector<1x20xf32>
    %104 = arith.addf %102, %103 : vector<1x20xf32>
    %c0_87 = arith.constant 0 : index
    %c0_88 = arith.constant 0 : index
    %105 = vector.load %arg16[%c0_87, %c0_88] : memref<84x20xf32, #tpu.memory_space<vmem>>, vector<84x20xf32>
    %cst_89 = arith.constant dense<0.000000e+00> : vector<1x20xf32>
    %106 = tpu.matmul %100, %105, %cst_89 {dimension_numbers = #tpu.dot_dimension_numbers<[1], [0], [0], [1], [0, 0, 1, 1], [], []>} : vector<1x84xf32>, vector<84x20xf32>, vector<1x20xf32> -> vector<1x20xf32>
    %c0_90 = arith.constant 0 : index
    %c0_91 = arith.constant 0 : index
    %107 = vector.load %arg17[%c0_90, %c0_91] : memref<1x20xf32, #tpu.memory_space<vmem>>, vector<1x20xf32>
    %108 = arith.addf %106, %107 : vector<1x20xf32>
    %c0_92 = arith.constant 0 : index
    %c0_93 = arith.constant 0 : index
    %109 = vector.load %arg1[%c0_92, %c0_93] : memref<1x20xf32, #tpu.memory_space<vmem>>, vector<1x20xf32>
    %cst_94 = arith.constant 5.000000e-01 : f32
    %110 = vector.broadcast %cst_94 : f32 to vector<1x20xf32>
    %111 = arith.mulf %110, %108 : vector<1x20xf32>
    %112 = math.exp %111 : vector<1x20xf32>
    %113 = arith.mulf %109, %112 : vector<1x20xf32>
    %114 = arith.addf %113, %104 : vector<1x20xf32>
    %115 = tpu.concatenate %114, %104, %108 in 0 : vector<1x20xf32>, vector<1x20xf32>, vector<1x20xf32> -> vector<3x20xf32>
    %c0_95 = arith.constant 0 : index
    %c0_96 = arith.constant 0 : index
    %116 = vector.load %arg18[%c0_95, %c0_96] : memref<3x20xf32, #tpu.memory_space<vmem>>, vector<3x20xf32>
    tpu.vector_store %arg18[%c0_95, %c0_96], %115 {strides = array<i32>} : memref<3x20xf32, #tpu.memory_space<vmem>>, vector<3x20xf32>,
    return
  }
}

</mosaic_0001>

<bundles_post_ra>
// kernel: lenet5_forward.1
= control target key start
LH: loop header
LB: loop body
LE: loop exit
PB: predicated region body
PF: predicated region fallthrough
CT: control target
= control target key end

     0   :  { %v3263_v3 = vmov 0.0   ;;  %vm84_vm0 = vcmask 1046528   ;;  %vm92_vm1 = vcmask 261120   ;;  %vm540_vm2 = vcmask 1043456   ;;  %s4522_s2 = inlined_call_operand.vmem [shape: f32[5,32,168], index: 2, kind: input, shape index: {}]   ;;  %s4523_s0 = inlined_call_operand.vmem [shape: f32[32,32], index: 0, kind: input, shape index: {}]   ;;  %s4524_s3 = inlined_call_operand.vmem [shape: f32[1,168], index: 3, kind: input, shape index: {}]   ;;  %s4525_s5 = inlined_call_operand.vmem [shape: f32[168,84], index: 5, kind: input, shape index: {}]   ;;  %s4526_s4 = inlined_call_operand.vmem [shape: f32[14,28], index: 4, kind: input, shape index: {}]   ;;  %s4527_s6 = inlined_call_operand.vmem [shape: f32[5,84,160], index: 6, kind: input, shape index: {}]   ;;  %s4528_s9 = inlined_call_operand.vmem [shape: f32[160,80], index: 9, kind: input, shape index: {}]   ;;  %s4529_s7 = inlined_call_operand.vmem [shape: f32[1,160], index: 7, kind: input, shape index: {}]   ;;  %s4530_s8 = inlined_call_operand.vmem [shape: f32[5,10], index: 8, kind: input, shape index: {}]   ;;  %s4531_s10 = inlined_call_operand.vmem [shape: f32[5,80,120], index: 10, kind: input, shape index: {}]   ;;  %s4532_s12 = inlined_call_operand.vmem [shape: f32[120,84], index: 12, kind: input, shape index: {}]   ;;  %s4533_s14 = inlined_call_operand.vmem [shape: f32[84,20], index: 14, kind: input, shape index: {}]   ;;  %s4534_s16 = inlined_call_operand.vmem [shape: f32[84,20], index: 16, kind: input, shape index: {}]   ;;  %s4535_s11 = inlined_call_operand.vmem [shape: f32[1,120], index: 11, kind: input, shape index: {}]   ;;  %s4536_s13 = inlined_call_operand.vmem [shape: f32[1,84], index: 13, kind: input, shape index: {}]   ;;  %s4537_s17 = inlined_call_operand.vmem [shape: f32[1,20], index: 17, kind: input, shape index: {}]   ;;  %s4538_s15 = inlined_call_operand.vmem [shape: f32[1,20], index: 15, kind: input, shape index: {}]   ;;  %s4539_s1 = inlined_call_operand.vmem [shape: f32[1,20], index: 1, kind: input, shape index: {}]   ;;  %s4540_s18 = inlined_call_operand.vmem [shape: f32[3,20], index: 18, kind: output, shape index: {}]  }
   0x1   :  { %4543 = sst [smem:[#allocation2_spill]] %s4522_s2  ;;  %165 = vmatprep.mubr.f32.mxu0 %v3263_v3  ;;  %752 = vmatprep.mubr.f32.mxu1 %v3263_v3  ;;  %vm296_vm3 = vcmask 1045504   ;;  %vm418_vm4 = vcmask 1044480   ;;  %vm3265_vm5 = vmmov 1   ;;  %vm675_vm7 = vcmask 228352  }
   0x2   :  { %4544 = sst [smem:[#allocation3_spill]] %s4523_s0  ;;  %s4546_s29 = sld [smem:[#allocation2_spill]]  ;;  %vm2906_vm6 = vmpackc.low %vm540_vm2, %vm3265_vm5  ;;  %vm786_vm8 = vcmask 326656   ;;  %vm920_vm9 = vcmask 687104   ;;  %vm1467_vm10 = vcmask 1041408   ;;  %vm1463_vm12 = vcmask 80896  }
   0x3   :  { %4545 = sst [smem:[#allocation4_spill]] %s4524_s3  ;;  %s4547_s19 = sld [smem:[#allocation3_spill]]  ;;  %vm3042_vm11 = vmpackc.low %vm1467_vm10, %vm3265_vm5  ;;  %vm3266_vm13 = vmmov 0   ;;  %vm1661_vm14 = vcmask 654336   ;;  %vm2079_vm15 = vcmask 982016  }
   0x4   :  { %s4548_s21 = sld [smem:[#allocation4_spill]] }
   0x8   :  { %v2349_v0 = vld [vmem:[%s4546_s29 + $0x48] sm:$0xff]  ;;  %v2351_v1 = vld [vmem:[%s4546_s29 + $0x58] sm:$0xff]  ;;  %v2348_v2 = vld [vmem:[%s4546_s29 + $0x40] sm:$0xff] }
   0x9   :  { %v2861_v4 = vpack.c.bf16 %v2351_v1, %v2349_v0  ;;  %v2350_v5 = vld [vmem:[%s4546_s29 + $0x50] sm:$0xff]  ;;  %v2353_v6 = vld [vmem:[%s4546_s29 + $0x68] sm:$0xff]  ;;  %v2355_v7 = vld [vmem:[%s4546_s29 + $0x78] sm:$0xff] }
   0xa   :  { %v2863_v8 = vpack.c.bf16 %v2350_v5, %v2348_v2  ;;  %v2865_v9 = vpack.c.bf16 %v2355_v7, %v2353_v6  ;;  %v2352_v10 = vld [vmem:[%s4546_s29 + $0x60] sm:$0xff]  ;;  %v2354_v11 = vld [vmem:[%s4546_s29 + $0x70] sm:$0xff]  ;;  %v3396_v13 = vld [vmem:[%s4547_s19 + $0x8] sm:$0xff] }
   0xb   :  { %v3391_v12 = vld [vmem:[%s4547_s19] sm:$0xff]  ;;  %2862 = vmatprep.subr.bf16.mxu0 %v2861_v4  ;;  %v64_v14 = vld [vmem:[%s4546_s29 + $0x8] sm:$0xff]  ;;  %v2867_v15 = vpack.c.bf16 %v2354_v11, %v2352_v10  ;;  %v86_v17 = vrot.slane %v3396_v13, 1  ;;  %v3406_v18 = vld [vmem:[%s4547_s19 + $0x10] sm:$0xff]  ;;  %v542_v35 = vrot.slane %v3396_v13, 4  ;;  %v298_v59 = vrot.slane %v3396_v13, 2 }
   0xc   :  { %2864 = vmatpush1.bf16.msra.mxu0 %v2863_v8  ;;  %v85_v16 = vrot.slane %v3391_v12, 1  ;;  %v66_v19 = vld [vmem:[%s4546_s29 + $0x18] sm:$0xff]  ;;  %v63_v21 = vld [vmem:[%s4546_s29] sm:$0xff]  ;;  %v65_v22 = vld [vmem:[%s4546_s29 + $0x10] sm:$0xff]  ;;  %v88_v25 = vrot.slane %v3406_v18, 1  ;;  %v541_v34 = vrot.slane %v3391_v12, 4 }
   0xd   :  { %2866 = vmatprep.subr.bf16.mxu0 %v2865_v9  ;;  %v2869_v20 = vpack.c.bf16 %v66_v19, %v64_v14  ;;  %v68_v23 = vld [vmem:[%s4546_s29 + $0x28] sm:$0xff]  ;;  %v70_v24 = vld [vmem:[%s4546_s29 + $0x38] sm:$0xff]  ;;  %v2871_v27 = vpack.c.bf16 %v65_v22, %v63_v21  ;;  %v67_v30 = vld [vmem:[%s4546_s29 + $0x20] sm:$0xff]  ;;  %v544_v37 = vrot.slane %v3406_v18, 4  ;;  %v297_v58 = vrot.slane %v3391_v12, 2 }
   0xe   :  { %v87_v26 = vsel %vm84_vm0, %v85_v16, %v86_v17  ;;  %v3428_v28 = vld [vmem:[%s4547_s19 + $0x18] sm:$0xff]  ;;  %v2873_v29 = vpack.c.bf16 %v70_v24, %v68_v23  ;;  %v69_v31 = vld [vmem:[%s4546_s29 + $0x30] sm:$0xff]  ;;  %v2365_v32 = vld [vmem:[%s4546_s29 + $0x88] sm:$0xff]  ;;  %v89_v36 = vsel %vm84_vm0, %v86_v17, %v88_v25  ;;  %v3450_v40 = vsel %vm540_vm2, %v541_v34, %v542_v35 }
   0xf   :  { %v2367_v33 = vld [vmem:[%s4546_s29 + $0x98] sm:$0xff]  ;;  %v90_v38 = vrot.slane %v3428_v28, 1  ;;  %v2875_v39 = vpack.c.bf16 %v69_v31, %v67_v30  ;;  %v546_v41 = vrot.slane %v3428_v28, 4  ;;  %v3454_v43 = vsel %vm540_vm2, %v542_v35, %v544_v37  ;;  %v2364_v46 = vld [vmem:[%s4546_s29 + $0x80] sm:$0xff]  ;;  %v2366_v47 = vld [vmem:[%s4546_s29 + $0x90] sm:$0xff] }
  0x10   :  { %2868 = vmatpush1.bf16.msra.mxu0 %v2867_v15  ;;  %v2877_v42 = vpack.c.bf16 %v2367_v33, %v2365_v32  ;;  %v2369_v48 = vld [vmem:[%s4546_s29 + $0xa8] sm:$0xff]  ;;  %v2371_v49 = vld [vmem:[%s4546_s29 + $0xb8] sm:$0xff]  ;;  %v2879_v50 = vpack.c.bf16 %v2366_v47, %v2364_v46  ;;  %v2368_v52 = vld [vmem:[%s4546_s29 + $0xa0] sm:$0xff]  ;;  %v299_v0 = vsel %vm296_vm3, %v297_v58, %v298_v59  ;;  %v300_v1 = vrot.slane %v3406_v18, 2 }
  0x11   :  { %2870 = vmatprep.subr.bf16.mxu0 %v2869_v20  ;;  %v3459_v44 = vsel %vm540_vm2, %v544_v37, %v546_v41  ;;  %v91_v45 = vsel %vm84_vm0, %v88_v25, %v90_v38  ;;  %v2881_v51 = vpack.c.bf16 %v2371_v49, %v2369_v48  ;;  %v2370_v53 = vld [vmem:[%s4546_s29 + $0xb0] sm:$0xff]  ;;  %v2377_v54 = vld [vmem:[%s4546_s29 + $0xc8] sm:$0xff]  ;;  %v2379_v55 = vld [vmem:[%s4546_s29 + $0xd8] sm:$0xff]  ;;  %v302_v10 = vrot.slane %v3428_v28, 2 }
  0x12   :  { %v2883_v56 = vpack.c.bf16 %v2370_v53, %v2368_v52  ;;  %v2885_v57 = vpack.c.bf16 %v2379_v55, %v2377_v54  ;;  %v2376_v60 = vld [vmem:[%s4546_s29 + $0xc0] sm:$0xff]  ;;  %v2378_v61 = vld [vmem:[%s4546_s29 + $0xd0] sm:$0xff]  ;;  %v2381_v62 = vld [vmem:[%s4546_s29 + $0xe8] sm:$0xff]  ;;  %v301_v9 = vsel %vm296_vm3, %v298_v59, %v300_v1  ;;  %v419_v16 = vrot.slane %v3391_v12, 3 }
  0x13   :  { %2356 = vmatmul.mubr.msk.f32.vlgmr.msra.gmra.mrb[0].mxu0 %vm92_vm1, %v87_v26  ;;  %v2383_v63 = vld [vmem:[%s4546_s29 + $0xf8] sm:$0xff]  ;;  %v2887_v2 = vpack.c.bf16 %v2378_v61, %v2376_v60  ;;  %v2380_v5 = vld [vmem:[%s4546_s29 + $0xe0] sm:$0xff]  ;;  %v2382_v6 = vld [vmem:[%s4546_s29 + $0xf0] sm:$0xff]  ;;  %v303_v15 = vsel %vm296_vm3, %v300_v1, %v302_v10  ;;  %v420_v17 = vrot.slane %v3396_v13, 3  ;;  %v3264_v31 = vmov 0.0|0.0  }
  0x14   :  { %171 = vmatprep.mubr.f32.mxu0 %v3263_v3  ;;  %2872 = vmatpush1.bf16.msra.mxu0 %v2871_v27  ;;  %v2889_v4 = vpack.c.bf16 %v2383_v63, %v2381_v62  ;;  %v2389_v7 = vld [vmem:[%s4546_s29 + $0x108] sm:$0xff]  ;;  %v2391_v8 = vld [vmem:[%s4546_s29 + $0x118] sm:$0xff]  ;;  %v2891_v11 = vpack.c.bf16 %v2382_v6, %v2380_v5  ;;  %v2388_v19 = vld [vmem:[%s4546_s29 + $0x100] sm:$0xff]  ;;  %v655_v32 = vlaneseq }
  0x15   :  { %2874 = vmatprep.subr.bf16.mxu0 %v2873_v29  ;;  %v2893_v14 = vpack.c.bf16 %v2391_v8, %v2389_v7  ;;  %v2390_v20 = vld [vmem:[%s4546_s29 + $0x110] sm:$0xff]  ;;  %v2393_v21 = vld [vmem:[%s4546_s29 + $0x128] sm:$0xff]  ;;  %v2395_v22 = vld [vmem:[%s4546_s29 + $0x138] sm:$0xff]  ;;  %v424_v29 = vrot.slane %v3428_v28, 3 }
  0x16   :  { %v2895_v23 = vpack.c.bf16 %v2390_v20, %v2388_v19  ;;  %v2897_v24 = vpack.c.bf16 %v2395_v22, %v2393_v21  ;;  %v2392_v25 = vld [vmem:[%s4546_s29 + $0x120] sm:$0xff]  ;;  %v2394_v26 = vld [vmem:[%s4546_s29 + $0x130] sm:$0xff]  ;;  %v3589_v33 = vshrl.u32 %v655_v32, 7  ;;  %v766_v59 = vld [vmem:[%s4525_s5 + $0x8] sm:$0xff] }
  0x17   :  { %2357 = vmatmul.mubr.msk.f32.gmra.mrb[2].mxu0 %vm92_vm1, %v89_v36  ;;  %v653_v35 = vld [vmem:[%s4548_s21] sm:$0x3]  ;;  %v767_v62 = vld [vmem:[%s4525_s5 + $0x10] sm:$0xff]  ;;  %v768_v63 = vld [vmem:[%s4525_s5 + $0x18] sm:$0xff] }
  0x18   :  { %177 = vmatprep.mubr.f32.mxu0 %v3263_v3  ;;  %2876 = vmatpush1.bf16.msra.mxu0 %v2875_v39  ;;  %v657_v34 = vsub.s32 0, %v3589_v33  ;;  %v661_v36 = vsub.s32 1, %v3589_v33  ;;  %v765_v58 = vld [vmem:[%s4525_s5] sm:$0xff]  ;;  %v2915_v1 = vpack.c.bf16 %v768_v63, %v767_v62  ;;  %v771_v6 = vld [vmem:[%s4525_s5 + $0x30] sm:$0xff]  ;;  %v772_v7 = vld [vmem:[%s4525_s5 + $0x38] sm:$0xff] }
  0x19   :  { %2878 = vmatprep.subr.bf16.mxu0 %v2877_v42  ;;  %v673_v60 = vld [vmem:[%s4526_s4] sm:$0xff]  ;;  %v2912_v61 = vpack.c.bf16 %v766_v59, %v765_v58  ;;  %v2921_v8 = vpack.c.bf16 %v772_v7, %v771_v6  ;;  %v778_v19 = vld [vmem:[%s4525_s5 + $0x68] sm:$0xff]  ;;  %v779_v21 = vld [vmem:[%s4525_s5 + $0x70] sm:$0xff] }
  0x1a   :  { %v662_v39 = vrot.slane %v653_v35, %v661_v36  ;;  %v780_v22 = vld [vmem:[%s4525_s5 + $0x78] sm:$0xff]  ;;  %v2420_v58 = vld [vmem:[%s4527_s6 + $0x120] sm:$0xff]  ;;  %v2422_v63 = vld [vmem:[%s4527_s6 + $0x130] sm:$0xff] }
  0x1b   :  { %2358 = vmatmul.mubr.msk.f32.gmra.mrb[4].mxu0 %vm92_vm1, %v91_v45  ;;  %v2423_v59 = vld [vmem:[%s4527_s6 + $0x138] sm:$0xff]  ;;  %v2426_v6 = vld [vmem:[%s4527_s6 + $0x150] sm:$0xf] }
  0x1c   :  { %183 = vmatprep.mubr.f32.mxu0 %v3263_v3  ;;  %v1563_v33 = vld [vmem:[%s4528_s9 + $0x90] sm:$0xff] }
  0x1f   :  { %2359 = vmatmul.mubr.msk.f32.gmra.mrb[6].mxu0 %vm92_vm1, %v90_v38 }
  0x20   :  { %262 = vmatprep.mubr.f32.mxu0 %v3263_v3 }
  0x23   :  { %2360 = vmatmul.mubr.msk.f32.vlgmr.msra.gmra.mrb[0].mxu0 %vm92_vm1, %v3391_v12  ;;  %v421_v12 = vsel %vm418_vm4, %v419_v16, %v420_v17 }
  0x24   :  { %268 = vmatprep.mubr.f32.mxu0 %v3263_v3  ;;  %2880 = vmatpush1.bf16.msra.mxu0 %v2879_v50 }
  0x25   :  { %2882 = vmatprep.subr.bf16.mxu0 %v2881_v51 }
  0x27   :  { %2361 = vmatmul.mubr.msk.f32.gmra.mrb[2].mxu0 %vm92_vm1, %v3396_v13  ;;  %v422_v13 = vrot.slane %v3406_v18, 3 }
  0x28   :  { %274 = vmatprep.mubr.f32.mxu0 %v3263_v3  ;;  %2884 = vmatpush1.bf16.msra.mxu0 %v2883_v56 }
  0x29   :  { %2886 = vmatprep.subr.bf16.mxu0 %v2885_v57  ;;  %v423_v27 = vsel %vm418_vm4, %v420_v17, %v422_v13  ;;  %v425_v30 = vsel %vm418_vm4, %v422_v13, %v424_v29  ;;  %v777_v17 = vld [vmem:[%s4525_s5 + $0x60] sm:$0xff] }
  0x2a   :  { %v2930_v20 = vpack.c.bf16 %v778_v19, %v777_v17  ;;  %v781_v13 = vld [vmem:[%s4525_s5 + $0x80] sm:$0xff]  ;;  %v875_v19 = vld [vmem:[%s4527_s6 + $0x28] sm:$0xff] }
  0x2b   :  { %2362 = vmatmul.mubr.msk.f32.gmra.mrb[4].mxu0 %vm92_vm1, %v3406_v18  ;;  %v2899_v18 = vpack.c.bf16 %v2394_v26, %v2392_v25  ;;  %v783_v25 = vld [vmem:[%s4525_s5 + $0x90] sm:$0xff]  ;;  %v784_v26 = vld [vmem:[%s4525_s5 + $0x98] sm:$0xff] }
  0x2c   :  { %280 = vmatprep.mubr.f32.mxu0 %v3263_v3 }
  0x2f   :  { %2363 = vmatmul.mubr.msk.f32.gmra.mrb[6].mxu0 %vm92_vm1, %v3428_v28  ;;  %v658_v28 = vrot.slane %v653_v35, %v657_v34  ;;  %v2406_v35 = vld [vmem:[%s4527_s6 + $0xb0] sm:$0xff] }
  0x30   :  { %376 = vmatprep.mubr.f32.mxu0 %v3263_v3 }
  0x33   :  { %2372 = vmatmul.mubr.msk.f32.vlgmr.msra.gmra.mrb[0].mxu0 %vm92_vm1, %v299_v0  ;;  %v674_v0 = vld [vmem:[%s4526_s4 + $0x8] sm:$0x3f] }
  0x34   :  { %382 = vmatprep.mubr.f32.mxu0 %v3263_v3  ;;  %2888 = vmatpush1.bf16.msra.mxu0 %v2887_v2  ;;  %v769_v2 = vld [vmem:[%s4525_s5 + $0x20] sm:$0xff] }
  0x35   :  { %2890 = vmatprep.subr.bf16.mxu0 %v2889_v4  ;;  %v770_v4 = vld [vmem:[%s4525_s5 + $0x28] sm:$0xff] }
  0x36   :  { %v2918_v5 = vpack.c.bf16 %v770_v4, %v769_v2  ;;  %v2427_v2 = vld [vmem:[%s4527_s6 + $0x158] sm:$0xf]  ;;  %v871_v4 = vld [vmem:[%s4527_s6 + $0x8] sm:$0xff] }
  0x37   :  { %2373 = vmatmul.mubr.msk.f32.gmra.mrb[2].mxu0 %vm92_vm1, %v301_v9  ;;  %v773_v9 = vld [vmem:[%s4525_s5 + $0x40] sm:$0xff] }
  0x38   :  { %388 = vmatprep.mubr.f32.mxu0 %v3263_v3  ;;  %2892 = vmatpush1.bf16.msra.mxu0 %v2891_v11 }
  0x39   :  { %2894 = vmatprep.subr.bf16.mxu0 %v2893_v14  ;;  %v775_v14 = vld [vmem:[%s4525_s5 + $0x50] sm:$0xff] }
  0x3b   :  { %2374 = vmatmul.mubr.msk.f32.gmra.mrb[4].mxu0 %vm92_vm1, %v303_v15  ;;  %v776_v15 = vld [vmem:[%s4525_s5 + $0x58] sm:$0xff] }
  0x3c   :  { %394 = vmatprep.mubr.f32.mxu0 %v3263_v3  ;;  %v2927_v16 = vpack.c.bf16 %v776_v15, %v775_v14  ;;  %v870_v14 = vld [vmem:[%s4527_s6] sm:$0xff]  ;;  %v872_v15 = vld [vmem:[%s4527_s6 + $0x10] sm:$0xff] }
  0x3d   :  { %v2963_v17 = vpack.c.bf16 %v872_v15, %v870_v14  ;;  %v2446_v14 = vld [vmem:[%s4527_s6 + $0x1b0] sm:$0xff]  ;;  %v2449_v15 = vld [vmem:[%s4527_s6 + $0x1c8] sm:$0xff] }
  0x3f   :  { %2375 = vmatmul.mubr.msk.f32.gmra.mrb[6].mxu0 %vm92_vm1, %v302_v10  ;;  %v774_v10 = vld [vmem:[%s4525_s5 + $0x48] sm:$0xff] }
  0x40   :  { %498 = vmatprep.mubr.f32.mxu0 %v3263_v3  ;;  %v2924_v11 = vpack.c.bf16 %v774_v10, %v773_v9 }
  0x43   :  { %2384 = vmatmul.mubr.msk.f32.vlgmr.msra.gmra.mrb[0].mxu0 %vm92_vm1, %v421_v12  ;;  %v2933_v12 = vpack.c.bf16 %v780_v22, %v779_v21 }
  0x44   :  { %504 = vmatprep.mubr.f32.mxu0 %v3263_v3  ;;  %2896 = vmatpush1.bf16.msra.mxu0 %v2895_v23  ;;  %v782_v23 = vld [vmem:[%s4525_s5 + $0x88] sm:$0xff] }
  0x45   :  { %2898 = vmatprep.subr.bf16.mxu0 %v2897_v24  ;;  %v2936_v24 = vpack.c.bf16 %v782_v23, %v781_v13 }
  0x47   :  { %2385 = vmatmul.mubr.msk.f32.gmra.mrb[2].mxu0 %vm92_vm1, %v423_v27  ;;  %v2939_v27 = vpack.c.bf16 %v784_v26, %v783_v25 }
  0x48   :  { %510 = vmatprep.mubr.f32.mxu0 %v3263_v3  ;;  %2900 = vmatpush1.bf16.msra.mxu0 %v2899_v18  ;;  %v2407_v18 = vld [vmem:[%s4527_s6 + $0xb8] sm:$0xff] }
  0x49   :  { %3047 = vmatprep.subr.bf16.mxu0 %v3264_v31 }
  0x4b   :  { %2386 = vmatmul.mubr.msk.f32.gmra.mrb[4].mxu0 %vm92_vm1, %v425_v30  ;;  %v2409_v30 = vld [vmem:[%s4527_s6 + $0xc8] sm:$0xff] }
  0x4c   :  { %516 = vmatprep.mubr.f32.mxu0 %v3263_v3  ;;  %v2941_v32 = vpack.c.bf16 %v2409_v30, %v2407_v18  ;;  %v874_v18 = vld [vmem:[%s4527_s6 + $0x20] sm:$0xff]  ;;  %v876_v30 = vld [vmem:[%s4527_s6 + $0x30] sm:$0xff] }
  0x4f   :  { %2387 = vmatmul.mubr.msk.f32.gmra.mrb[6].mxu0 %vm92_vm1, %v424_v29  ;;  %v785_v29 = vld [vmem:[%s4525_s5 + $0xa0] sm:$0xff] }
  0x50   :  { %620 = vmatprep.mubr.f32.mxu0 %v3263_v3 }
  0x53   :  { %2396 = vmatmul.mubr.msk.f32.vlgmr.msra.gmra.mrb[0].mxu0 %vm92_vm1, %v3450_v40 }
  0x54   :  { %626 = vmatprep.mubr.f32.mxu0 %v3263_v3 }
  0x57   :  { %2397 = vmatmul.mubr.msk.f32.gmra.mrb[2].mxu0 %vm92_vm1, %v3454_v43 }
  0x58   :  { %632 = vmatprep.mubr.f32.mxu0 %v3263_v3 }
  0x5b   :  { %2398 = vmatmul.mubr.msk.f32.gmra.mrb[4].mxu0 %vm92_vm1, %v3459_v44 }
  0x5c   :  { %638 = vmatprep.mubr.f32.mxu0 %v3263_v3 }
  0x5f   :  { %2399 = vmatmul.mubr.msk.f32.gmra.mrb[6].mxu0 %vm92_vm1, %v546_v41 }
 0x126   :  { %v622_v37 = vpop.f32.mrb[0].mxu0 }
 0x127   :  { %v624_v38 = vpop.f32.mrb[1].mxu0  ;;  %v665_v41 = vadd.f32 %v658_v28, %v622_v37  ;;  %v2408_v37 = vld [vmem:[%s4527_s6 + $0xc0] sm:$0xff] }
 0x128   :  { %v666_v44 = vadd.f32 %v662_v39, %v624_v38  ;;  %v2943_v38 = vpack.c.bf16 %v2408_v37, %v2406_v35  ;;  %v879_v35 = vld [vmem:[%s4527_s6 + $0x48] sm:$0xff]  ;;  %v881_v37 = vld [vmem:[%s4527_s6 + $0x58] sm:$0xff] }
 0x12a   :  { %v628_v40 = vpop.f32.mrb[2].mxu0 }
 0x12b   :  { %v667_v42 = vadd.f32 %v658_v28, %v628_v40  ;;  %v630_v43 = vpop.f32.mrb[3].mxu0 }
 0x12c   :  { %v668_v45 = vadd.f32 %v662_v39, %v630_v43  ;;  %v2413_v43 = vld [vmem:[%s4527_s6 + $0xe8] sm:$0xff] }
 0x12d   :  { %v2903_v46 = vpack.c.bf16 %v667_v42, %v665_v41  ;;  %v2411_v42 = vld [vmem:[%s4527_s6 + $0xd8] sm:$0xff] }
 0x12e   :  { %v634_v47 = vpop.f32.mrb[4].mxu0  ;;  %v2901_v48 = vpack.c.bf16 %v668_v45, %v666_v44  ;;  %v2945_v44 = vpack.c.bf16 %v2413_v43, %v2411_v42  ;;  %v2410_v45 = vld [vmem:[%s4527_s6 + $0xd0] sm:$0xff]  ;;  %v878_v42 = vld [vmem:[%s4527_s6 + $0x40] sm:$0xff] }
 0x12f   :  { %v636_v49 = vpop.f32.mrb[5].mxu0  ;;  %v669_v51 = vadd.f32 %v658_v28, %v634_v47  ;;  %v880_v43 = vld [vmem:[%s4527_s6 + $0x50] sm:$0xff] }
 0x130   :  { %2902 = vmatprep.subr.bf16.mxu1 %v2901_v48  ;;  %v670_v54 = vadd.f32 %v662_v39, %v636_v49  ;;  %v2415_v48 = vld [vmem:[%s4527_s6 + $0xf8] sm:$0xff]  ;;  %v2417_v49 = vld [vmem:[%s4527_s6 + $0x108] sm:$0xff] }
 0x131   :  { %2904 = vmatpush1.bf16.msra.mxu1 %v2903_v46  ;;  %v2412_v46 = vld [vmem:[%s4527_s6 + $0xe0] sm:$0xff] }
 0x132   :  { %v640_v50 = vpop.f32.mrb[6].mxu0  ;;  %v2947_v47 = vpack.c.bf16 %v2412_v46, %v2410_v45  ;;  %v885_v45 = vld [vmem:[%s4527_s6 + $0x78] sm:$0xff]  ;;  %v2971_v46 = vpack.c.bf16 %v880_v43, %v878_v42  ;;  %v2469_v43 = vld [vmem:[%s4527_s6 + $0x248] sm:$0xff] }
 0x133   :  { %v671_v52 = vadd.f32 %v658_v28, %v640_v50  ;;  %v642_v53 = vpop.f32.mrb[7].mxu0  ;;  %v2949_v50 = vpack.c.bf16 %v2417_v49, %v2415_v48  ;;  %v882_v48 = vld [vmem:[%s4527_s6 + $0x60] sm:$0xff]  ;;  %v884_v49 = vld [vmem:[%s4527_s6 + $0x70] sm:$0xff]  ;;  %v2467_v42 = vld [vmem:[%s4527_s6 + $0x238] sm:$0xff] }
 0x134   :  { %v672_v55 = vadd.f32 %v662_v39, %v642_v53 }
 0x135   :  { %v2908_v56 = vpack.c.bf16 %v671_v52, %v669_v51  ;;  %v2414_v51 = vld [vmem:[%s4527_s6 + $0xf0] sm:$0xff]  ;;  %v2416_v52 = vld [vmem:[%s4527_s6 + $0x100] sm:$0xff] }
 0x136   :  { %v2905_v57 = vpack.c.bf16 %v672_v55, %v670_v54  ;;  %v2951_v53 = vpack.c.bf16 %v2416_v52, %v2414_v51  ;;  %v2419_v54 = vld [vmem:[%s4527_s6 + $0x118] sm:$0xff]  ;;  %v2421_v55 = vld [vmem:[%s4527_s6 + $0x128] sm:$0xff]  ;;  %v2975_v52 = vpack.c.bf16 %v884_v49, %v882_v48  ;;  %v2466_v48 = vld [vmem:[%s4527_s6 + $0x230] sm:$0xff] }
 0x137   :  { %v889_v51 = vld [vmem:[%s4527_s6 + $0x98] sm:$0xff]  ;;  %v2468_v49 = vld [vmem:[%s4527_s6 + $0x240] sm:$0xff] }
 0x138   :  { %2907 = vmatprep.subr.msk.bf16.mxu1 %vm2906_vm6, %v2905_v57  ;;  %v2953_v57 = vpack.c.bf16 %v2421_v55, %v2419_v54  ;;  %v886_v54 = vld [vmem:[%s4527_s6 + $0x80] sm:$0xff]  ;;  %v888_v55 = vld [vmem:[%s4527_s6 + $0x90] sm:$0xff] }
 0x139   :  { %2910 = vmatpush1.bf16.msk.msra.mxu1 %vm2906_vm6, %v2908_v56  ;;  %v2418_v56 = vld [vmem:[%s4527_s6 + $0x110] sm:$0xff] }
 0x13a   :  { %2911 = vmatprep.subr.bf16.mxu1 %v3264_v31 }
 0x13c   :  { %2402 = vmatmul.mubr.msk.f32.vlgmr.msra.gmra.mrb[0].mxu1 %vm675_vm7, %v673_v60  ;;  %v2425_v60 = vld [vmem:[%s4527_s6 + $0x148] sm:$0xff] }
 0x13d   :  { %758 = vmatprep.mubr.f32.mxu1 %v3263_v3  ;;  %2913 = vmatpush1.bf16.msra.mxu1 %v2912_v61  ;;  %v2955_v61 = vpack.c.bf16 %v2420_v58, %v2418_v56  ;;  %v2957_v62 = vpack.c.bf16 %v2425_v60, %v2423_v59  ;;  %v2979_v56 = vpack.c.bf16 %v888_v55, %v886_v54  ;;  %v2437_v58 = vld [vmem:[%s4527_s6 + $0x168] sm:$0xff]  ;;  %v2439_v59 = vld [vmem:[%s4527_s6 + $0x178] sm:$0xff]  ;;  %v2436_v60 = vld [vmem:[%s4527_s6 + $0x160] sm:$0xff] }
 0x13e   :  { %2914 = vmatprep.subr.bf16.mxu1 %v3264_v31  ;;  %v2470_v54 = vld [vmem:[%s4527_s6 + $0x250] sm:$0xff]  ;;  %v2472_v55 = vld [vmem:[%s4527_s6 + $0x260] sm:$0xff] }
 0x140   :  { %2403 = vmatmul.mubr.msk.f32.gmra.mrb[2].mxu1 %vm675_vm7, %v674_v0  ;;  %v2424_v0 = vld [vmem:[%s4527_s6 + $0x140] sm:$0xff] }
 0x141   :  { %2916 = vmatpush1.bf16.msra.mxu1 %v2915_v1  ;;  %v2959_v1 = vpack.c.bf16 %v2424_v0, %v2422_v63  ;;  %v2443_v63 = vld [vmem:[%s4527_s6 + $0x198] sm:$0xff]  ;;  %v890_v0 = vld [vmem:[%s4527_s6 + $0xa0] sm:$0xf] }
 0x142   :  { %2917 = vmatprep.subr.bf16.mxu1 %v3264_v31 }
 0x145   :  { %2919 = vmatpush1.bf16.msra.mxu1 %v2918_v5  ;;  %v873_v5 = vld [vmem:[%s4527_s6 + $0x18] sm:$0xff] }
 0x146   :  { %2920 = vmatprep.subr.bf16.mxu1 %v3264_v31  ;;  %v2961_v7 = vpack.c.bf16 %v873_v5, %v871_v4  ;;  %v2440_v5 = vld [vmem:[%s4527_s6 + $0x180] sm:$0xff] }
 0x149   :  { %2922 = vmatpush1.bf16.msra.mxu1 %v2921_v8 }
 0x14a   :  { %2923 = vmatprep.subr.bf16.mxu1 %v3264_v31 }
 0x14d   :  { %2925 = vmatpush1.bf16.msra.mxu1 %v2924_v11 }
 0x14e   :  { %2926 = vmatprep.subr.bf16.mxu1 %v3264_v31 }
 0x151   :  { %2928 = vmatpush1.bf16.msra.mxu1 %v2927_v16 }
 0x152   :  { %2929 = vmatprep.subr.bf16.mxu1 %v3264_v31 }
 0x155   :  { %2931 = vmatpush1.bf16.msra.mxu1 %v2930_v20  ;;  %v877_v20 = vld [vmem:[%s4527_s6 + $0x38] sm:$0xff] }
 0x156   :  { %2932 = vmatprep.subr.bf16.mxu1 %v3264_v31 }
 0x159   :  { %2934 = vmatpush1.bf16.msra.mxu1 %v2933_v12 }
 0x15a   :  { %2935 = vmatprep.subr.bf16.mxu1 %v3264_v31 }
 0x15d   :  { %2937 = vmatpush1.bf16.msra.mxu1 %v2936_v24 }
 0x15e   :  { %2938 = vmatprep.subr.bf16.mxu1 %v3264_v31 }
 0x161   :  { %2940 = vmatpush1.bf16.msra.mxu1 %v2939_v27 }
 0x162   :  { %833 = vmatprep.subr.mxu1 %v3263_v3 }
 0x165   :  { %834 = vmatpush1.msra.mxu1 %v785_v29  ;;  %v2965_v29 = vpack.c.bf16 %v877_v20, %v875_v19  ;;  %v2448_v20 = vld [vmem:[%s4527_s6 + $0x1c0] sm:$0xff] }
 0x166   :  { %2942 = vmatprep.subr.bf16.mxu1 %v2941_v32 }
 0x20f   :  { %v754_v28 = vpop.f32.mrb[0].mxu1 }
 0x210   :  { %v756_v39 = vpop.f32.mrb[1].mxu1 }
 0x211   :  { %2404 = vmatprep.mubr.msk.f32.mxu1 %vm786_vm8, %v756_v39 }
 0x212   :  { %858 = vmatmul.mubr.f32.vlgmr.msra.gmra.mrb[4].mxu1 %v754_v28 }
 0x213   :  { %v760_v40 = vpop.f32.mrb[2].mxu1  ;;  %2944 = vmatpush1.bf16.msra.mxu1 %v2943_v38 }
 0x214   :  { %v762_v41 = vpop.f32.mrb[3].mxu1  ;;  %2946 = vmatprep.subr.bf16.mxu1 %v2945_v44  ;;  %v883_v44 = vld [vmem:[%s4527_s6 + $0x68] sm:$0xff] }
 0x215   :  { %2405 = vmatprep.mubr.msk.f32.mxu1 %vm786_vm8, %v762_v41  ;;  %v2969_v41 = vpack.c.bf16 %v881_v37, %v879_v35  ;;  %v2463_v35 = vld [vmem:[%s4527_s6 + $0x218] sm:$0xff]  ;;  %v2465_v37 = vld [vmem:[%s4527_s6 + $0x228] sm:$0xff] }
 0x216   :  { %863 = vmatmul.mubr.f32.gmra.mrb[6].mxu1 %v760_v40  ;;  %v2967_v40 = vpack.c.bf16 %v876_v30, %v874_v18  ;;  %v2454_v18 = vld [vmem:[%s4527_s6 + $0x1f0] sm:$0xff] }
 0x217   :  { %995 = vmatprep.mubr.f32.mxu1 %v3263_v3  ;;  %2948 = vmatpush1.bf16.msra.mxu1 %v2947_v47  ;;  %v2973_v47 = vpack.c.bf16 %v885_v45, %v883_v44  ;;  %v2456_v44 = vld [vmem:[%s4527_s6 + $0x200] sm:$0xf]  ;;  %v3001_v45 = vpack.c.bf16 %v2465_v37, %v2463_v35  ;;  %v2502_v35 = vld [vmem:[%s4527_s6 + $0x330] sm:$0xff]  ;;  %v2505_v37 = vld [vmem:[%s4527_s6 + $0x348] sm:$0xff] }
 0x218   :  { %2950 = vmatprep.subr.bf16.mxu1 %v2949_v50  ;;  %v887_v50 = vld [vmem:[%s4527_s6 + $0x88] sm:$0xff] }
 0x21b   :  { %2952 = vmatpush1.bf16.msra.mxu1 %v2951_v53  ;;  %v2977_v53 = vpack.c.bf16 %v889_v51, %v887_v50  ;;  %v2471_v50 = vld [vmem:[%s4527_s6 + $0x258] sm:$0xff]  ;;  %v2473_v51 = vld [vmem:[%s4527_s6 + $0x268] sm:$0xff] }
 0x21c   :  { %2954 = vmatprep.subr.bf16.mxu1 %v2953_v57  ;;  %v891_v57 = vld [vmem:[%s4527_s6 + $0xa8] sm:$0xf] }
 0x21f   :  { %2956 = vmatpush1.bf16.msra.mxu1 %v2955_v61  ;;  %v2438_v61 = vld [vmem:[%s4527_s6 + $0x170] sm:$0xff] }
 0x220   :  { %2958 = vmatprep.subr.bf16.mxu1 %v2957_v62  ;;  %v2441_v62 = vld [vmem:[%s4527_s6 + $0x188] sm:$0xff] }
 0x221   :  { %v2985_v4 = vpack.c.bf16 %v2443_v63, %v2441_v62 }
 0x223   :  { %2960 = vmatpush1.bf16.msra.mxu1 %v2959_v1  ;;  %v2981_v1 = vpack.c.bf16 %v2439_v59, %v2437_v58  ;;  %v2474_v59 = vld [vmem:[%s4527_s6 + $0x270] sm:$0xff] }
 0x224   :  { %2428 = vmatprep.subr.msk.mxu1 %vm540_vm2, %v2427_v2  ;;  %v2983_v2 = vpack.c.bf16 %v2438_v61, %v2436_v60  ;;  %v2476_v60 = vld [vmem:[%s4527_s6 + $0x280] sm:$0xff]  ;;  %v2479_v61 = vld [vmem:[%s4527_s6 + $0x298] sm:$0xff] }
 0x225   :  { %v3015_v62 = vpack.c.bf16 %v2476_v60, %v2474_v59  ;;  %v1556_v59 = vld [vmem:[%s4528_s9 + $0x58] sm:$0xff] }
 0x227   :  { %2429 = vmatpush1.msk.msra.mxu1 %vm540_vm2, %v2426_v6  ;;  %v2442_v6 = vld [vmem:[%s4527_s6 + $0x190] sm:$0xff] }
 0x228   :  { %2962 = vmatprep.subr.bf16.mxu1 %v2961_v7  ;;  %v2445_v7 = vld [vmem:[%s4527_s6 + $0x1a8] sm:$0xff] }
 0x2e5   :  { %v859_v8 = vpop.f32.mrb[4].mxu1 }
 0x2e6   :  { %v861_v9 = vpop.f32.mrb[5].mxu1  ;;  %3255 = vtanh.f32 %v859_v8  ;;  %v2447_v8 = vld [vmem:[%s4527_s6 + $0x1b8] sm:$0xff] }
 0x2e7   :  { %v2987_v9 = vpack.c.bf16 %v2442_v6, %v2440_v5  ;;  %v2489_v5 = vld [vmem:[%s4527_s6 + $0x2c8] sm:$0xff]  ;;  %v2491_v6 = vld [vmem:[%s4527_s6 + $0x2d8] sm:$0xff] }
 0x2e9   :  { %v864_v10 = vpop.f32.mrb[6].mxu1 }
 0x2ea   :  { %3257 = vtanh.f32 %v864_v10  ;;  %v866_v11 = vpop.f32.mrb[7].mxu1  ;;  %v2989_v10 = vpack.c.bf16 %v2447_v8, %v2445_v7  ;;  %v2488_v7 = vld [vmem:[%s4527_s6 + $0x2c0] sm:$0xff]  ;;  %v2490_v8 = vld [vmem:[%s4527_s6 + $0x2d0] sm:$0xff] }
 0x2eb   :  { %v2444_v11 = vld [vmem:[%s4527_s6 + $0x1a0] sm:$0xff] }
 0x2f0   :  { %v3764_v16 = vpop.eup %3255 }
 0x2f1   :  { %v917_v22 = vrot.slane %v3764_v16, 1  ;;  %v1118_v12 = vrot.slane %v3764_v16, 2  ;;  %v1235_v13 = vrot.slane %v3764_v16, 3  ;;  %v1352_v23 = vrot.slane %v3764_v16, 4 }
 0x2f4   :  { %v3772_v21 = vpop.eup %3257 }
 0x2f5   :  { %v918_v24 = vrot.slane %v3772_v21, 1  ;;  %v1119_v25 = vrot.slane %v3772_v21, 2  ;;  %v1236_v26 = vrot.slane %v3772_v21, 3  ;;  %v1353_v27 = vrot.slane %v3772_v21, 4 }
 0x2f7   :  { %v919_v32 = vsel %vm84_vm0, %v917_v22, %v918_v24  ;;  %v3798_v28 = vsel %vm296_vm3, %v1118_v12, %v1119_v25  ;;  %v3803_v38 = vsel %vm418_vm4, %v1235_v13, %v1236_v26  ;;  %v3808_v39 = vsel %vm540_vm2, %v1352_v23, %v1353_v27  ;;  %v2450_v22 = vld [vmem:[%s4527_s6 + $0x1d0] sm:$0xff]  ;;  %v2453_v12 = vld [vmem:[%s4527_s6 + $0x1e8] sm:$0xff]  ;;  %v2455_v13 = vld [vmem:[%s4527_s6 + $0x1f8] sm:$0xff] }
 0x2f8   :  { %2430 = vmatmul.mubr.msk.f32.vlgmr.msra.gmra.mrb[8].mxu1 %vm920_vm9, %v919_v32  ;;  %v2995_v23 = vpack.c.bf16 %v2450_v22, %v2448_v20  ;;  %v2457_v32 = vld [vmem:[%s4527_s6 + $0x208] sm:$0xf]  ;;  %v2499_v22 = vld [vmem:[%s4527_s6 + $0x318] sm:$0xff]  ;;  %vm2339_vm0 = vcmask 1040384  }
 0x2f9   :  { %2964 = vmatpush1.bf16.msra.mxu1 %v2963_v17  ;;  %1001 = vmatprep.mubr.f32.mxu1 %v3263_v3  ;;  %v2991_v17 = vpack.c.bf16 %v2446_v14, %v2444_v11  ;;  %v2482_v11 = vld [vmem:[%s4527_s6 + $0x2b0] sm:$0xf]  ;;  %v3021_v14 = vpack.c.bf16 %v2491_v6, %v2489_v5  ;;  %v2497_v20 = vld [vmem:[%s4527_s6 + $0x308] sm:$0xff]  ;;  %v1446_v6 = vld [vmem:[%s4529_s7] sm:$0x3] }
 0x2fa   :  { %2966 = vmatprep.subr.bf16.mxu1 %v2965_v29  ;;  %v2452_v29 = vld [vmem:[%s4527_s6 + $0x1e0] sm:$0xff] }
 0x2fb   :  { %v2999_v30 = vpack.c.bf16 %v2454_v18, %v2452_v29  ;;  %v2501_v29 = vld [vmem:[%s4527_s6 + $0x328] sm:$0xff] }
 0x2fc   :  { %2431 = vmatmul.mubr.msk.f32.gmra.mrb[10].mxu1 %vm920_vm9, %v918_v24  ;;  %v2997_v24 = vpack.c.bf16 %v2455_v13, %v2453_v12  ;;  %v3029_v13 = vpack.c.bf16 %v2499_v22, %v2497_v20 }
 0x2fd   :  { %2968 = vmatpush1.bf16.msra.mxu1 %v2967_v40  ;;  %1082 = vmatprep.mubr.f32.mxu1 %v3263_v3  ;;  %v2462_v40 = vld [vmem:[%s4527_s6 + $0x210] sm:$0xff] }
 0x2fe   :  { %2970 = vmatprep.subr.bf16.mxu1 %v2969_v41  ;;  %v2464_v41 = vld [vmem:[%s4527_s6 + $0x220] sm:$0xff] }
 0x301   :  { %2972 = vmatpush1.bf16.msra.mxu1 %v2971_v46  ;;  %v3003_v46 = vpack.c.bf16 %v2464_v41, %v2462_v40 }
 0x302   :  { %2974 = vmatprep.subr.bf16.mxu1 %v2973_v47  ;;  %v3005_v47 = vpack.c.bf16 %v2469_v43, %v2467_v42  ;;  %v2504_v42 = vld [vmem:[%s4527_s6 + $0x340] sm:$0xff]  ;;  %v2506_v43 = vld [vmem:[%s4527_s6 + $0x350] sm:$0xff] }
 0x305   :  { %2976 = vmatpush1.bf16.msra.mxu1 %v2975_v52  ;;  %v3007_v52 = vpack.c.bf16 %v2468_v49, %v2466_v48  ;;  %v1546_v48 = vld [vmem:[%s4528_s9 + $0x8] sm:$0xff] }
 0x306   :  { %2978 = vmatprep.subr.bf16.mxu1 %v2977_v53  ;;  %v3009_v53 = vpack.c.bf16 %v2473_v51, %v2471_v50  ;;  %v1549_v50 = vld [vmem:[%s4528_s9 + $0x20] sm:$0xff]  ;;  %v1550_v51 = vld [vmem:[%s4528_s9 + $0x28] sm:$0xff] }
 0x309   :  { %2980 = vmatpush1.bf16.msra.mxu1 %v2979_v56  ;;  %v2475_v56 = vld [vmem:[%s4527_s6 + $0x278] sm:$0xff] }
 0x30a   :  { %2432 = vmatprep.subr.msk.mxu1 %vm540_vm2, %v891_v57  ;;  %v3011_v57 = vpack.c.bf16 %v2472_v55, %v2470_v54  ;;  %v1552_v54 = vld [vmem:[%s4528_s9 + $0x38] sm:$0xff] }
 0x30d   :  { %2433 = vmatpush1.msk.msra.mxu1 %vm540_vm2, %v890_v0  ;;  %v2478_v0 = vld [vmem:[%s4527_s6 + $0x290] sm:$0xff] }
 0x30e   :  { %2434 = vmatmul.mubr.msk.f32.vlgmr.msra.gmra.mrb[8].mxu1 %vm920_vm9, %v3764_v16  ;;  %2982 = vmatprep.subr.bf16.mxu1 %v2981_v1  ;;  %v2451_v16 = vld [vmem:[%s4527_s6 + $0x1d8] sm:$0xff]  ;;  %v2480_v1 = vld [vmem:[%s4527_s6 + $0x2a0] sm:$0xff] }
 0x30f   :  { %2984 = vmatpush1.bf16.msra.mxu1 %v2983_v2  ;;  %1088 = vmatprep.mubr.f32.mxu1 %v3263_v3  ;;  %v2993_v19 = vpack.c.bf16 %v2451_v16, %v2449_v15  ;;  %v3019_v2 = vpack.c.bf16 %v2480_v1, %v2478_v0  ;;  %v3023_v15 = vpack.c.bf16 %v2490_v8, %v2488_v7  ;;  %v1560_v0 = vld [vmem:[%s4528_s9 + $0x78] sm:$0xff] }
 0x310   :  { %2986 = vmatprep.subr.bf16.mxu1 %v2985_v4  ;;  %v2483_v4 = vld [vmem:[%s4527_s6 + $0x2b8] sm:$0xf]  ;;  %v1451_v8 = vrot.slane %v1446_v6, %v657_v34  ;;  %v1462_v34 = vld [vmem:[%s4530_s8] sm:$0x1f] }
 0x312   :  { %2435 = vmatmul.mubr.msk.f32.gmra.mrb[10].mxu1 %vm920_vm9, %v3772_v21  ;;  %v1548_v21 = vld [vmem:[%s4528_s9 + $0x18] sm:$0xff] }
 0x313   :  { %2988 = vmatpush1.bf16.msra.mxu1 %v2987_v9  ;;  %1195 = vmatprep.mubr.f32.mxu1 %v3263_v3  ;;  %v2493_v9 = vld [vmem:[%s4527_s6 + $0x2e8] sm:$0xff] }
 0x314   :  { %2990 = vmatprep.subr.bf16.mxu1 %v2989_v10  ;;  %v2495_v10 = vld [vmem:[%s4527_s6 + $0x2f8] sm:$0xff] }
 0x315   :  { %v3025_v16 = vpack.c.bf16 %v2495_v10, %v2493_v9  ;;  %v1455_v10 = vrot.slane %v1446_v6, %v661_v36  ;;  %v1564_v36 = vld [vmem:[%s4528_s9 + $0x98] sm:$0xff] }
 0x316   :  { %v2555_v6 = vld [vmem:[%s4531_s10 + $0x158] sm:$0xff] }
 0x317   :  { %2992 = vmatpush1.bf16.msra.mxu1 %v2991_v17  ;;  %v2492_v17 = vld [vmem:[%s4527_s6 + $0x2e0] sm:$0xff] }
 0x318   :  { %2994 = vmatprep.subr.bf16.mxu1 %v2993_v19  ;;  %v2494_v19 = vld [vmem:[%s4527_s6 + $0x2f0] sm:$0xff] }
 0x319   :  { %v3027_v12 = vpack.c.bf16 %v2494_v19, %v2492_v17 }
 0x31b   :  { %2996 = vmatpush1.bf16.msra.mxu1 %v2995_v23  ;;  %v2496_v23 = vld [vmem:[%s4527_s6 + $0x300] sm:$0xff] }
 0x31c   :  { %2998 = vmatprep.subr.bf16.mxu1 %v2997_v24  ;;  %v2498_v24 = vld [vmem:[%s4527_s6 + $0x310] sm:$0xff] }
 0x31d   :  { %v3031_v18 = vpack.c.bf16 %v2498_v24, %v2496_v23  ;;  %v2531_v23 = vld [vmem:[%s4531_s10 + $0xa8] sm:$0xff] }
 0x31f   :  { %3000 = vmatpush1.bf16.msra.mxu1 %v2999_v30 }
 0x320   :  { %2458 = vmatprep.subr.msk.mxu1 %vm540_vm2, %v2457_v32  ;;  %v2500_v32 = vld [vmem:[%s4527_s6 + $0x320] sm:$0xff] }
 0x321   :  { %v3035_v40 = vpack.c.bf16 %v2502_v35, %v2500_v32  ;;  %v2535_v32 = vld [vmem:[%s4531_s10 + $0xc8] sm:$0xff] }
 0x323   :  { %2459 = vmatpush1.msk.msra.mxu1 %vm540_vm2, %v2456_v44  ;;  %v3039_v44 = vpack.c.bf16 %v2506_v43, %v2504_v42  ;;  %v2539_v42 = vld [vmem:[%s4531_s10 + $0xe8] sm:$0xff] }
 0x324   :  { %2460 = vmatmul.mubr.msk.f32.vlgmr.msra.gmra.mrb[8].mxu1 %vm920_vm9, %v3798_v28  ;;  %3002 = vmatprep.subr.bf16.mxu1 %v3001_v45  ;;  %v2477_v28 = vld [vmem:[%s4527_s6 + $0x288] sm:$0xff] }
 0x325   :  { %3004 = vmatpush1.bf16.msra.mxu1 %v3003_v46  ;;  %1201 = vmatprep.mubr.f32.mxu1 %v3263_v3  ;;  %v3013_v58 = vpack.c.bf16 %v2477_v28, %v2475_v56  ;;  %v2509_v45 = vld [vmem:[%s4527_s6 + $0x368] sm:$0xf]  ;;  %v2508_v46 = vld [vmem:[%s4527_s6 + $0x360] sm:$0xf] }
 0x326   :  { %3006 = vmatprep.subr.bf16.mxu1 %v3005_v47  ;;  %v1545_v47 = vld [vmem:[%s4528_s9] sm:$0xff]  ;;  %v1554_v28 = vld [vmem:[%s4528_s9 + $0x48] sm:$0xff] }
 0x327   :  { %v3048_v49 = vpack.c.bf16 %v1546_v48, %v1545_v47  ;;  %v1553_v56 = vld [vmem:[%s4528_s9 + $0x40] sm:$0xff] }
 0x328   :  { %2461 = vmatmul.mubr.msk.f32.gmra.mrb[10].mxu1 %vm920_vm9, %v1119_v25  ;;  %v2481_v25 = vld [vmem:[%s4527_s6 + $0x2a8] sm:$0xff] }
 0x329   :  { %3008 = vmatpush1.bf16.msra.mxu1 %v3007_v52  ;;  %1312 = vmatprep.mubr.f32.mxu1 %v3263_v3  ;;  %v3017_v63 = vpack.c.bf16 %v2481_v25, %v2479_v61  ;;  %v3054_v52 = vpack.c.bf16 %v1550_v51, %v1549_v50  ;;  %v1557_v61 = vld [vmem:[%s4528_s9 + $0x60] sm:$0xff]  ;;  %v1558_v25 = vld [vmem:[%s4528_s9 + $0x68] sm:$0xff]  ;;  %v2523_v50 = vld [vmem:[%s4531_s10 + $0x78] sm:$0xff] }
 0x32a   :  { %3010 = vmatprep.subr.bf16.mxu1 %v3009_v53  ;;  %3049 = vmatpush1.bf16.msra.mxu0 %v3048_v49  ;;  %v1551_v53 = vld [vmem:[%s4528_s9 + $0x30] sm:$0xff]  ;;  %v2521_v49 = vld [vmem:[%s4531_s10 + $0x68] sm:$0xff] }
 0x32b   :  { %3050 = vmatprep.subr.bf16.mxu0 %v3264_v31  ;;  %v3057_v55 = vpack.c.bf16 %v1552_v54, %v1551_v53  ;;  %v2525_v53 = vld [vmem:[%s4531_s10 + $0x88] sm:$0xff] }
 0x32d   :  { %3012 = vmatpush1.bf16.msra.mxu1 %v3011_v57  ;;  %v3060_v57 = vpack.c.bf16 %v1554_v28, %v1553_v56  ;;  %v2527_v56 = vld [vmem:[%s4531_s10 + $0x98] sm:$0xff] }
 0x32e   :  { %3014 = vmatprep.subr.bf16.mxu1 %v3013_v58  ;;  %v1555_v58 = vld [vmem:[%s4528_s9 + $0x50] sm:$0xff] }
 0x32f   :  { %v3063_v60 = vpack.c.bf16 %v1556_v59, %v1555_v58  ;;  %v1639_v58 = vld [vmem:[%s4531_s10 + $0x8] sm:$0xff]  ;;  %v2552_v59 = vld [vmem:[%s4531_s10 + $0x140] sm:$0xff] }
 0x331   :  { %3016 = vmatpush1.bf16.msra.mxu1 %v3015_v62  ;;  %v3066_v62 = vpack.c.bf16 %v1558_v25, %v1557_v61 }
 0x332   :  { %3018 = vmatprep.subr.bf16.mxu1 %v3017_v63  ;;  %v1559_v63 = vld [vmem:[%s4528_s9 + $0x70] sm:$0xff] }
 0x333   :  { %v3069_v1 = vpack.c.bf16 %v1560_v0, %v1559_v63  ;;  %v1640_v63 = vld [vmem:[%s4531_s10 + $0x10] sm:$0xff] }
 0x335   :  { %3020 = vmatpush1.bf16.msra.mxu1 %v3019_v2  ;;  %v1561_v2 = vld [vmem:[%s4528_s9 + $0x80] sm:$0xff] }
 0x336   :  { %2484 = vmatprep.subr.msk.mxu1 %vm540_vm2, %v2483_v4  ;;  %v1562_v4 = vld [vmem:[%s4528_s9 + $0x88] sm:$0xff] }
 0x337   :  { %v3072_v5 = vpack.c.bf16 %v1562_v4, %v1561_v2  ;;  %v1641_v4 = vld [vmem:[%s4531_s10 + $0x18] sm:$0xff] }
 0x339   :  { %2485 = vmatpush1.msk.msra.mxu1 %vm540_vm2, %v2482_v11 }
 0x33a   :  { %2486 = vmatmul.mubr.msk.f32.vlgmr.msra.gmra.mrb[8].mxu1 %vm920_vm9, %v3803_v38  ;;  %3022 = vmatprep.subr.bf16.mxu1 %v3021_v14  ;;  %v2503_v38 = vld [vmem:[%s4527_s6 + $0x338] sm:$0xff] }
 0x33b   :  { %3024 = vmatpush1.bf16.msra.mxu1 %v3023_v15  ;;  %1318 = vmatprep.mubr.f32.mxu1 %v3263_v3  ;;  %v3033_v30 = vpack.c.bf16 %v2503_v38, %v2501_v29  ;;  %v2532_v29 = vld [vmem:[%s4531_s10 + $0xb0] sm:$0xff]  ;;  %v2533_v38 = vld [vmem:[%s4531_s10 + $0xb8] sm:$0xff] }
 0x33c   :  { %3026 = vmatprep.subr.bf16.mxu1 %v3025_v16 }
 0x33e   :  { %2487 = vmatmul.mubr.msk.f32.gmra.mrb[10].mxu1 %vm920_vm9, %v1236_v26  ;;  %v2507_v26 = vld [vmem:[%s4527_s6 + $0x358] sm:$0xff] }
 0x33f   :  { %3028 = vmatpush1.bf16.msra.mxu1 %v3027_v12  ;;  %1429 = vmatprep.mubr.f32.mxu1 %v3263_v3  ;;  %v3037_v41 = vpack.c.bf16 %v2507_v26, %v2505_v37  ;;  %v3075_v12 = vpack.c.bf16 %v1564_v36, %v1563_v33  ;;  %v2536_v37 = vld [vmem:[%s4531_s10 + $0xd0] sm:$0xff]  ;;  %v2537_v26 = vld [vmem:[%s4531_s10 + $0xd8] sm:$0xff]  ;;  %v1646_v36 = vld [vmem:[%s4531_s10 + $0x40] sm:$0xff] }
 0x340   :  { %3030 = vmatprep.subr.bf16.mxu1 %v3029_v13  ;;  %v2530_v13 = vld [vmem:[%s4531_s10 + $0xa0] sm:$0xff] }
 0x341   :  { %v3108_v24 = vpack.c.bf16 %v2531_v23, %v2530_v13  ;;  %v2560_v13 = vld [vmem:[%s4531_s10 + $0x180] sm:$0xff]  ;;  %v2561_v23 = vld [vmem:[%s4531_s10 + $0x188] sm:$0xff] }
 0x343   :  { %3032 = vmatpush1.bf16.msra.mxu1 %v3031_v18  ;;  %v3111_v18 = vpack.c.bf16 %v2533_v38, %v2532_v29  ;;  %v3150_v29 = vpack.c.bf16 %v2561_v23, %v2560_v13  ;;  %v2541_v38 = vld [vmem:[%s4531_s10 + $0xf0] sm:$0xff]  ;;  %v2242_v13 = vld [vmem:[%s4534_s16] sm:$0xff]  ;;  %v2243_v23 = vld [vmem:[%s4534_s16 + $0x8] sm:$0xff] }
 0x344   :  { %3034 = vmatprep.subr.bf16.mxu1 %v3033_v30  ;;  %v2534_v30 = vld [vmem:[%s4531_s10 + $0xc0] sm:$0xff] }
 0x345   :  { %v3114_v35 = vpack.c.bf16 %v2535_v32, %v2534_v30 }
 0x347   :  { %3036 = vmatpush1.bf16.msra.mxu1 %v3035_v40  ;;  %v3117_v40 = vpack.c.bf16 %v2537_v26, %v2536_v37  ;;  %v2544_v37 = vld [vmem:[%s4531_s10 + $0x108] sm:$0xff] }
 0x348   :  { %3038 = vmatprep.subr.bf16.mxu1 %v3037_v41  ;;  %v2538_v41 = vld [vmem:[%s4531_s10 + $0xe0] sm:$0xff] }
 0x349   :  { %v3120_v43 = vpack.c.bf16 %v2539_v42, %v2538_v41  ;;  %v2546_v41 = vld [vmem:[%s4531_s10 + $0x118] sm:$0xff] }
 0x34b   :  { %3040 = vmatpush1.bf16.msra.mxu1 %v3039_v44  ;;  %v2518_v44 = vld [vmem:[%s4531_s10 + $0x50] sm:$0xff] }
 0x34c   :  { %2510 = vmatprep.subr.msk.mxu1 %vm540_vm2, %v2509_v45  ;;  %v2519_v45 = vld [vmem:[%s4531_s10 + $0x58] sm:$0xff] }
 0x34d   :  { %v3078_v47 = vpack.c.bf16 %v2519_v45, %v2518_v44  ;;  %v2548_v44 = vld [vmem:[%s4531_s10 + $0x128] sm:$0xff] }
 0x34f   :  { %2511 = vmatpush1.msk.msra.mxu1 %vm540_vm2, %v2508_v46 }
 0x350   :  { %2512 = vmatmul.mubr.msk.f32.vlgmr.msra.gmra.mrb[8].mxu1 %vm920_vm9, %v3808_v39  ;;  %v1547_v39 = vld [vmem:[%s4528_s9 + $0x10] sm:$0xff] }
 0x351   :  { %1435 = vmatprep.mubr.f32.mxu1 %v3263_v3 }
 0x354   :  { %2513 = vmatmul.mubr.msk.f32.gmra.mrb[10].mxu1 %vm920_vm9, %v1353_v27  ;;  %v3051_v27 = vpack.c.bf16 %v1548_v21, %v1547_v39  ;;  %v2520_v39 = vld [vmem:[%s4531_s10 + $0x60] sm:$0xff] }
 0x355   :  { %1538 = vmatprep.mubr.f32.mxu1 %v3263_v3  ;;  %v3081_v21 = vpack.c.bf16 %v2521_v49, %v2520_v39  ;;  %v2063_v49 = vld [vmem:[%s4532_s12] sm:$0xff] }
 0x356   :  { %3052 = vmatpush1.bf16.msra.mxu0 %v3051_v27  ;;  %v2522_v27 = vld [vmem:[%s4531_s10 + $0x70] sm:$0xff] }
 0x357   :  { %3053 = vmatprep.subr.bf16.mxu0 %v3264_v31  ;;  %v3084_v51 = vpack.c.bf16 %v2523_v50, %v2522_v27  ;;  %v2065_v50 = vld [vmem:[%s4532_s12 + $0x10] sm:$0xff] }
 0x35a   :  { %3055 = vmatpush1.bf16.msra.mxu0 %v3054_v52  ;;  %v2524_v52 = vld [vmem:[%s4531_s10 + $0x80] sm:$0xff] }
 0x35b   :  { %3056 = vmatprep.subr.bf16.mxu0 %v3264_v31  ;;  %v3087_v54 = vpack.c.bf16 %v2525_v53, %v2524_v52  ;;  %v2067_v53 = vld [vmem:[%s4532_s12 + $0x20] sm:$0xff] }
 0x35e   :  { %3058 = vmatpush1.bf16.msra.mxu0 %v3057_v55  ;;  %v2526_v55 = vld [vmem:[%s4531_s10 + $0x90] sm:$0xff] }
 0x35f   :  { %3059 = vmatprep.subr.bf16.mxu0 %v3264_v31  ;;  %v3090_v28 = vpack.c.bf16 %v2527_v56, %v2526_v55  ;;  %v2069_v56 = vld [vmem:[%s4532_s12 + $0x30] sm:$0xff] }
 0x362   :  { %3061 = vmatpush1.bf16.msra.mxu0 %v3060_v57  ;;  %v1638_v57 = vld [vmem:[%s4531_s10] sm:$0xff] }
 0x363   :  { %3062 = vmatprep.subr.bf16.mxu0 %v3264_v31  ;;  %v3093_v25 = vpack.c.bf16 %v1639_v58, %v1638_v57  ;;  %v2071_v58 = vld [vmem:[%s4532_s12 + $0x40] sm:$0xff] }
 0x366   :  { %3064 = vmatpush1.bf16.msra.mxu0 %v3063_v60  ;;  %v2553_v60 = vld [vmem:[%s4531_s10 + $0x148] sm:$0xff] }
 0x367   :  { %3065 = vmatprep.subr.bf16.mxu0 %v3264_v31 }
 0x36a   :  { %3067 = vmatpush1.bf16.msra.mxu0 %v3066_v62  ;;  %v3138_v62 = vpack.c.bf16 %v2553_v60, %v2552_v59  ;;  %v2072_v59 = vld [vmem:[%s4532_s12 + $0x48] sm:$0xff] }
 0x36b   :  { %3068 = vmatprep.subr.bf16.mxu0 %v3264_v31  ;;  %v3165_v60 = vpack.c.bf16 %v2072_v59, %v2071_v58 }
 0x36e   :  { %3070 = vmatpush1.bf16.msra.mxu0 %v3069_v1 }
 0x36f   :  { %3071 = vmatprep.subr.bf16.mxu0 %v3264_v31 }
 0x372   :  { %3073 = vmatpush1.bf16.msra.mxu0 %v3072_v5  ;;  %v2554_v5 = vld [vmem:[%s4531_s10 + $0x150] sm:$0xff] }
 0x373   :  { %3074 = vmatprep.subr.bf16.mxu0 %v3264_v31 }
 0x376   :  { %3076 = vmatpush1.bf16.msra.mxu0 %v3075_v12  ;;  %v1647_v12 = vld [vmem:[%s4531_s10 + $0x48] sm:$0xff] }
 0x377   :  { %3077 = vmatprep.subr.bf16.mxu0 %v3264_v31 }
 0x423   :  { %v1431_v7 = vpop.f32.mrb[8].mxu1 }
 0x424   :  { %v1433_v9 = vpop.f32.mrb[9].mxu1  ;;  %v1458_v14 = vadd.f32 %v1451_v8, %v1431_v7  ;;  %v3096_v7 = vpack.c.bf16 %v1641_v4, %v1640_v63  ;;  %v2075_v63 = vld [vmem:[%s4532_s12 + $0x60] sm:$0xff] }
 0x425   :  { %v1459_v17 = vadd.f32 %v1455_v10, %v1433_v9  ;;  %v1642_v9 = vld [vmem:[%s4531_s10 + $0x20] sm:$0xff] }
 0x426   :  { %v2154_v4 = vld [vmem:[%s4533_s14] sm:$0xff] }
 0x427   :  { %v1437_v11 = vpop.f32.mrb[10].mxu1 }
 0x428   :  { %v1460_v15 = vadd.f32 %v1451_v8, %v1437_v11  ;;  %v1439_v16 = vpop.f32.mrb[11].mxu1  ;;  %v3141_v8 = vpack.c.bf16 %v2555_v6, %v2554_v5  ;;  %v2556_v11 = vld [vmem:[%s4531_s10 + $0x160] sm:$0xff]  ;;  %v2155_v5 = vld [vmem:[%s4533_s14 + $0x8] sm:$0xff] }
 0x429   :  { %v1461_v19 = vadd.f32 %v1455_v10, %v1439_v16  ;;  %v1643_v10 = vld [vmem:[%s4531_s10 + $0x28] sm:$0xff]  ;;  %v3174_v6 = vpack.c.bf16 %v2155_v5, %v2154_v4 }
 0x42a   :  { %v3044_v20 = vpack.c.bf16 %v1460_v15, %v1458_v14  ;;  %v2557_v14 = vld [vmem:[%s4531_s10 + $0x168] sm:$0xff]  ;;  %v3099_v15 = vpack.c.bf16 %v1643_v10, %v1642_v9 }
 0x42b   :  { %v3041_v22 = vpack.c.bf16 %v1461_v19, %v1459_v17  ;;  %v3144_v16 = vpack.c.bf16 %v2557_v14, %v2556_v11  ;;  %v1644_v17 = vld [vmem:[%s4531_s10 + $0x30] sm:$0xff]  ;;  %v1645_v19 = vld [vmem:[%s4531_s10 + $0x38] sm:$0xff] }
 0x42d   :  { %3043 = vmatprep.subr.msk.bf16.mxu1 %vm3042_vm11, %v3041_v22  ;;  %v2559_v22 = vld [vmem:[%s4531_s10 + $0x178] sm:$0xff] }
 0x42e   :  { %3046 = vmatpush1.bf16.msk.msra.mxu1 %vm3042_vm11, %v3044_v20  ;;  %v2558_v20 = vld [vmem:[%s4531_s10 + $0x170] sm:$0xff] }
 0x42f   :  { %3107 = vmatprep.subr.bf16.mxu1 %v3264_v31  ;;  %v3147_v33 = vpack.c.bf16 %v2559_v22, %v2558_v20 }
 0x431   :  { %2516 = vmatmul.mubr.msk.f32.vlgmr.msra.gmra.mrb[12].mxu1 %vm1463_vm12, %v1462_v34  ;;  %v3102_v34 = vpack.c.bf16 %v1645_v19, %v1644_v17 }
 0x432   :  { %3109 = vmatpush3.bf16.msra.mxu1 %v3108_v24  ;;  %2729 = vmatprep.mubr.msk.f32.mxu1 %vm3266_vm13, %v3263_v3  ;;  %v3105_v24 = vpack.c.bf16 %v1647_v12, %v1646_v36 }
 0x433   :  { %3110 = vmatprep.subr.bf16.mxu1 %v3264_v31 }
 0x436   :  { %3112 = vmatpush3.bf16.msra.mxu1 %v3111_v18  ;;  %v2542_v18 = vld [vmem:[%s4531_s10 + $0xf8] sm:$0xff] }
 0x437   :  { %3113 = vmatprep.subr.bf16.mxu1 %v3264_v31  ;;  %v3123_v30 = vpack.c.bf16 %v2542_v18, %v2541_v38  ;;  %v3189_v38 = vpack.c.bf16 %v2243_v23, %v2242_v13 }
 0x43a   :  { %3115 = vmatpush3.bf16.msra.mxu1 %v3114_v35  ;;  %v2543_v35 = vld [vmem:[%s4531_s10 + $0x100] sm:$0xff] }
 0x43b   :  { %3116 = vmatprep.subr.bf16.mxu1 %v3264_v31  ;;  %v3126_v26 = vpack.c.bf16 %v2544_v37, %v2543_v35  ;;  %v2158_v37 = vld [vmem:[%s4533_s14 + $0x20] sm:$0xff] }
 0x43e   :  { %3118 = vmatpush3.bf16.msra.mxu1 %v3117_v40  ;;  %v2545_v40 = vld [vmem:[%s4531_s10 + $0x110] sm:$0xff] }
 0x43f   :  { %3119 = vmatprep.subr.bf16.mxu1 %v3264_v31  ;;  %v3129_v42 = vpack.c.bf16 %v2546_v41, %v2545_v40  ;;  %v2246_v40 = vld [vmem:[%s4534_s16 + $0x20] sm:$0xff] }
 0x442   :  { %3121 = vmatpush3.bf16.msra.mxu1 %v3120_v43  ;;  %v2547_v43 = vld [vmem:[%s4531_s10 + $0x120] sm:$0xff] }
 0x443   :  { %3137 = vmatprep.subr.bf16.mxu1 %v3264_v31  ;;  %v3132_v45 = vpack.c.bf16 %v2548_v44, %v2547_v43  ;;  %v2160_v44 = vld [vmem:[%s4533_s14 + $0x30] sm:$0xff] }
 0x504   :  { %v1540_v46 = vpop.f32.mrb[12].mxu1 }
 0x505   :  { %v1542_v48 = vpop.f32.mrb[13].mxu1 }
 0x506   :  { %2517 = vmatprep.mubr.msk.f32.mxu0 %vm92_vm1, %v1542_v48  ;;  %vm2342_vm1 = vcmask 157696  }
 0x507   :  { %1633 = vmatmul.mubr.f32.vlgmr.msra.gmra.mrb[8].mxu0 %v1540_v46  ;;  %v2549_v46 = vld [vmem:[%s4531_s10 + $0x130] sm:$0xff] }
 0x508   :  { %3079 = vmatpush3.bf16.msra.mxu0 %v3078_v47  ;;  %2683 = vmatprep.mubr.msk.f32.mxu0 %vm3266_vm13, %v3263_v3  ;;  %v2550_v47 = vld [vmem:[%s4531_s10 + $0x138] sm:$0xff] }
 0x509   :  { %3080 = vmatprep.subr.bf16.mxu0 %v3264_v31  ;;  %v3135_v48 = vpack.c.bf16 %v2550_v47, %v2549_v46  ;;  %v2248_v46 = vld [vmem:[%s4534_s16 + $0x30] sm:$0xff] }
 0x50c   :  { %3082 = vmatpush3.bf16.msra.mxu0 %v3081_v21  ;;  %v2064_v21 = vld [vmem:[%s4532_s12 + $0x8] sm:$0xff] }
 0x50d   :  { %3083 = vmatprep.subr.bf16.mxu0 %v3264_v31  ;;  %v3153_v27 = vpack.c.bf16 %v2064_v21, %v2063_v49  ;;  %v2163_v49 = vld [vmem:[%s4533_s14 + $0x48] sm:$0xff] }
 0x510   :  { %3085 = vmatpush3.bf16.msra.mxu0 %v3084_v51  ;;  %v2066_v51 = vld [vmem:[%s4532_s12 + $0x18] sm:$0xff] }
 0x511   :  { %3086 = vmatprep.subr.bf16.mxu0 %v3264_v31  ;;  %v3156_v52 = vpack.c.bf16 %v2066_v51, %v2065_v50  ;;  %v2251_v50 = vld [vmem:[%s4534_s16 + $0x48] sm:$0xff] }
 0x514   :  { %3088 = vmatpush3.bf16.msra.mxu0 %v3087_v54  ;;  %v2068_v54 = vld [vmem:[%s4532_s12 + $0x28] sm:$0xff] }
 0x515   :  { %3089 = vmatprep.subr.bf16.mxu0 %v3264_v31  ;;  %v3159_v55 = vpack.c.bf16 %v2068_v54, %v2067_v53  ;;  %v2164_v53 = vld [vmem:[%s4533_s14 + $0x50] sm:$0xf] }
 0x516   :  { %v2252_v54 = vld [vmem:[%s4534_s16 + $0x50] sm:$0xf] }
 0x518   :  { %3091 = vmatpush3.bf16.msra.mxu0 %v3090_v28  ;;  %v2070_v28 = vld [vmem:[%s4532_s12 + $0x38] sm:$0xff] }
 0x519   :  { %3092 = vmatprep.subr.bf16.mxu0 %v3264_v31  ;;  %v3162_v57 = vpack.c.bf16 %v2070_v28, %v2069_v56 }
 0x5da   :  { %v4253_v61 = vpop.f32.mrb[8].mxu0 }
 0x5db   :  { %v1660_v0 = vrot.slane %v4253_v61, 1  ;;  %v1817_v1 = vrot.slane %v4253_v61, 2  ;;  %v1636_v2 = vpop.f32.mrb[9].mxu0  ;;  %v1987_v32 = vrot.slane %v4253_v61, 4  ;;  %v1902_v39 = vrot.slane %v4253_v61, 3 }
 0x5dc   :  { %v2077_v2 = vld [vmem:[%s4532_s12 + $0x70] sm:$0xff] }
 0x5dd   :  { %2684 = vmatmul.mubr.msk.f32.vlgmr.msra.gmra.mrb[10].mxu0 %vm1661_vm14, %v1660_v0  ;;  %2730 = vmatmul.mubr.msk.f32.vlgmr.msra.gmra.mrb[14].mxu1 %vm1661_vm14, %v1817_v1  ;;  %v2076_v0 = vld [vmem:[%s4532_s12 + $0x68] sm:$0xff] }
 0x5de   :  { %3094 = vmatpush3.bf16.msra.mxu0 %v3093_v25  ;;  %3139 = vmatpush3.bf16.msra.mxu1 %v3138_v62  ;;  %v2074_v25 = vld [vmem:[%s4532_s12 + $0x58] sm:$0xff]  ;;  %v3171_v1 = vpack.c.bf16 %v2076_v0, %v2075_v63  ;;  %v2165_v0 = vld [vmem:[%s4538_s15] sm:$0x1] }
 0x5df   :  { %3095 = vmatprep.subr.bf16.mxu0 %v3264_v31  ;;  %3140 = vmatprep.subr.bf16.mxu1 %v3264_v31 }
 0x5e0   :  { %2706 = vmatprep.mubr.msk.f32.mxu0 %vm3266_vm13, %v3263_v3  ;;  %2775 = vmatprep.mubr.msk.f32.mxu1 %vm3266_vm13, %v3263_v3 }
 0x5e2   :  { %3097 = vmatpush3.bf16.msra.mxu0 %v3096_v7  ;;  %3142 = vmatpush3.bf16.msra.mxu1 %v3141_v8  ;;  %v2156_v7 = vld [vmem:[%s4533_s14 + $0x10] sm:$0xff]  ;;  %v2157_v8 = vld [vmem:[%s4533_s14 + $0x18] sm:$0xff] }
 0x5e3   :  { %3098 = vmatprep.subr.bf16.mxu0 %v3264_v31  ;;  %3143 = vmatprep.subr.bf16.mxu1 %v3264_v31  ;;  %v3177_v9 = vpack.c.bf16 %v2157_v8, %v2156_v7 }
 0x5e6   :  { %3100 = vmatpush3.bf16.msra.mxu0 %v3099_v15  ;;  %3145 = vmatpush3.bf16.msra.mxu1 %v3144_v16 }
 0x5e7   :  { %3101 = vmatprep.subr.bf16.mxu0 %v3264_v31  ;;  %3146 = vmatprep.subr.bf16.mxu1 %v3264_v31 }
 0x5ea   :  { %3103 = vmatpush3.bf16.msra.mxu0 %v3102_v34  ;;  %3148 = vmatpush3.bf16.msra.mxu1 %v3147_v33 }
 0x5eb   :  { %3104 = vmatprep.subr.bf16.mxu0 %v3264_v31  ;;  %3149 = vmatprep.subr.bf16.mxu1 %v3264_v31 }
 0x5ee   :  { %3106 = vmatpush3.bf16.msra.mxu0 %v3105_v24  ;;  %3151 = vmatpush3.bf16.msra.mxu1 %v3150_v29  ;;  %v2061_v24 = vld [vmem:[%s4535_s11] sm:$0x1] }
 0x5ef   :  { %3122 = vmatprep.subr.bf16.mxu0 %v3264_v31  ;;  %3173 = vmatprep.subr.bf16.mxu1 %v3264_v31 }
 0x5f1   :  { %2707 = vmatmul.mubr.msk.f32.vlgmr.msra.gmra.mrb[12].mxu0 %vm1661_vm14, %v4253_v61  ;;  %2776 = vmatmul.mubr.msk.f32.vlgmr.msra.gmra.mrb[16].mxu1 %vm1661_vm14, %v1987_v32  ;;  %v2073_v61 = vld [vmem:[%s4532_s12 + $0x50] sm:$0xff]  ;;  %v2245_v32 = vld [vmem:[%s4534_s16 + $0x18] sm:$0xff] }
 0x5f2   :  { %3124 = vmatpush3.bf16.msra.mxu0 %v3123_v30  ;;  %2752 = vmatprep.mubr.msk.f32.mxu0 %vm3266_vm13, %v3263_v3  ;;  %v3168_v62 = vpack.c.bf16 %v2074_v25, %v2073_v61  ;;  %v2244_v30 = vld [vmem:[%s4534_s16 + $0x10] sm:$0xff] }
 0x5f3   :  { %3125 = vmatprep.subr.bf16.mxu0 %v3264_v31  ;;  %2833 = vmatprep.mubr.msk.f32.mxu1 %vm3266_vm13, %v3263_v3  ;;  %v3192_v35 = vpack.c.bf16 %v2245_v32, %v2244_v30 }
 0x5f4   :  { %3175 = vmatpush3.bf16.msra.mxu1 %v3174_v6 }
 0x5f5   :  { %3176 = vmatprep.subr.bf16.mxu1 %v3264_v31 }
 0x5f6   :  { %3127 = vmatpush3.bf16.msra.mxu0 %v3126_v26  ;;  %v2159_v26 = vld [vmem:[%s4533_s14 + $0x28] sm:$0xff] }
 0x5f7   :  { %3128 = vmatprep.subr.bf16.mxu0 %v3264_v31  ;;  %v3180_v41 = vpack.c.bf16 %v2159_v26, %v2158_v37 }
 0x5f8   :  { %3178 = vmatpush3.bf16.msra.mxu1 %v3177_v9 }
 0x5f9   :  { %3179 = vmatprep.subr.bf16.mxu1 %v3264_v31 }
 0x5fa   :  { %3130 = vmatpush3.bf16.msra.mxu0 %v3129_v42  ;;  %v2247_v42 = vld [vmem:[%s4534_s16 + $0x28] sm:$0xff] }
 0x5fb   :  { %3131 = vmatprep.subr.bf16.mxu0 %v3264_v31  ;;  %v3195_v43 = vpack.c.bf16 %v2247_v42, %v2246_v40 }
 0x5fc   :  { %3181 = vmatpush3.bf16.msra.mxu1 %v3180_v41 }
 0x5fd   :  { %3182 = vmatprep.subr.bf16.mxu1 %v3264_v31 }
 0x5fe   :  { %3133 = vmatpush3.bf16.msra.mxu0 %v3132_v45  ;;  %v2161_v45 = vld [vmem:[%s4533_s14 + $0x38] sm:$0xff] }
 0x5ff   :  { %3134 = vmatprep.subr.bf16.mxu0 %v3264_v31  ;;  %v3183_v47 = vpack.c.bf16 %v2161_v45, %v2160_v44 }
 0x601   :  { %3184 = vmatpush3.bf16.msra.mxu1 %v3183_v47 }
 0x602   :  { %3136 = vmatpush3.bf16.msra.mxu0 %v3135_v48  ;;  %v2249_v48 = vld [vmem:[%s4534_s16 + $0x38] sm:$0xff]  ;;  %3185 = vmatprep.subr.bf16.mxu1 %v3264_v31 }
 0x603   :  { %3152 = vmatprep.subr.bf16.mxu0 %v3264_v31  ;;  %v3198_v21 = vpack.c.bf16 %v2249_v48, %v2248_v46 }
 0x605   :  { %2753 = vmatmul.mubr.msk.f32.vlgmr.msra.gmra.mrb[14].mxu0 %vm1661_vm14, %v1902_v39  ;;  %v2162_v39 = vld [vmem:[%s4533_s14 + $0x40] sm:$0xff] }
 0x606   :  { %2808 = vmatprep.mubr.msk.f32.mxu0 %vm3266_vm13, %v3263_v3  ;;  %3154 = vmatpush3.bf16.msra.mxu0 %v3153_v27  ;;  %v2250_v27 = vld [vmem:[%s4534_s16 + $0x40] sm:$0xff]  ;;  %v3186_v51 = vpack.c.bf16 %v2163_v49, %v2162_v39 }
 0x607   :  { %3155 = vmatprep.subr.bf16.mxu0 %v3264_v31 }
 0x608   :  { %3187 = vmatpush3.bf16.msra.mxu1 %v3186_v51 }
 0x609   :  { %2831 = vmatprep.subr.mxu1 %v3263_v3 }
 0x60a   :  { %3157 = vmatpush3.bf16.msra.mxu0 %v3156_v52  ;;  %v3201_v52 = vpack.c.bf16 %v2251_v50, %v2250_v27 }
 0x60b   :  { %3158 = vmatprep.subr.bf16.mxu0 %v3264_v31 }
 0x60c   :  { %2832 = vmatpush3.msk.msra.mxu1 %vm540_vm2, %v2164_v53 }
 0x60e   :  { %3160 = vmatpush3.bf16.msra.mxu0 %v3159_v55 }
 0x60f   :  { %3161 = vmatprep.subr.bf16.mxu0 %v3264_v31 }
 0x612   :  { %3163 = vmatpush3.bf16.msra.mxu0 %v3162_v57 }
 0x613   :  { %3164 = vmatprep.subr.bf16.mxu0 %v3264_v31 }
 0x616   :  { %3166 = vmatpush3.bf16.msra.mxu0 %v3165_v60 }
 0x617   :  { %3167 = vmatprep.subr.bf16.mxu0 %v3264_v31 }
 0x61a   :  { %3169 = vmatpush3.bf16.msra.mxu0 %v3168_v62 }
 0x61b   :  { %3170 = vmatprep.subr.bf16.mxu0 %v3264_v31 }
 0x61e   :  { %3172 = vmatpush3.bf16.msra.mxu0 %v3171_v1  ;;  %v2327_v1 = vld [vmem:[%s4539_s1] sm:$0x1] }
 0x61f   :  { %2806 = vmatprep.subr.mxu0 %v3263_v3 }
 0x622   :  { %2807 = vmatpush3.msra.mxu0 %v2077_v2 }
 0x623   :  { %3188 = vmatprep.subr.bf16.mxu0 %v3264_v31 }
 0x6b0   :  { %v1730_v10 = vpop.f32.mrb[10].mxu0  ;;  %v1886_v11 = vpop.f32.mrb[14].mxu1 }
 0x6b1   :  { %v2685_v14 = vpop.f32.mrb[11].mxu0  ;;  %v2731_v15 = vpop.f32.mrb[15].mxu1 }
 0x6c4   :  { %v1802_v16 = vpop.f32.mrb[12].mxu0  ;;  %v2056_v17 = vpop.f32.mrb[16].mxu1 }
 0x6c5   :  { %v1803_v19 = vadd.f32 %v1802_v16, %v1730_v10  ;;  %v2708_v20 = vpop.f32.mrb[13].mxu0  ;;  %v2777_v22 = vpop.f32.mrb[17].mxu1 }
 0x6c7   :  { %v1890_v34 = vadd.f32 %v1886_v11, %v1803_v19 }
 0x6d8   :  { %v1971_v33 = vpop.f32.mrb[14].mxu0 }
 0x6d9   :  { %v1975_v36 = vadd.f32 %v1971_v33, %v1890_v34  ;;  %v2754_v12 = vpop.f32.mrb[15].mxu0 }
 0x6db   :  { %v2060_v29 = vadd.f32 %v2056_v17, %v1975_v36 }
 0x6dd   :  { %v2062_v18 = vadd.f32 %v2061_v24, %v2060_v29 }
 0x6df   :  { %2809 = vmatmul.mubr.msk.f32.vlgmr.msra.gmra.mrb[16].mxu0 %vm2079_vm15, %v2062_v18 }
 0x6e0   :  { %3190 = vmatpush3.bf16.msra.mxu0 %v3189_v38  ;;  %2858 = vmatprep.mubr.msk.f32.mxu0 %vm3266_vm13, %v3263_v3 }
 0x6e1   :  { %3191 = vmatprep.subr.bf16.mxu0 %v3264_v31 }
 0x6e4   :  { %3193 = vmatpush3.bf16.msra.mxu0 %v3192_v35 }
 0x6e5   :  { %3194 = vmatprep.subr.bf16.mxu0 %v3264_v31 }
 0x6e8   :  { %3196 = vmatpush3.bf16.msra.mxu0 %v3195_v43 }
 0x6e9   :  { %3197 = vmatprep.subr.bf16.mxu0 %v3264_v31 }
 0x6ec   :  { %3199 = vmatpush3.bf16.msra.mxu0 %v3198_v21 }
 0x6ed   :  { %3200 = vmatprep.subr.bf16.mxu0 %v3264_v31  ;;  %v2078_v31 = vld [vmem:[%s4536_s13] sm:$0x1] }
 0x6f0   :  { %3202 = vmatpush3.bf16.msra.mxu0 %v3201_v52 }
 0x6f1   :  { %2856 = vmatprep.subr.mxu0 %v3263_v3  ;;  %v2253_v3 = vld [vmem:[%s4537_s17] sm:$0x1] }
 0x6f4   :  { %2857 = vmatpush3.msk.msra.mxu0 %vm540_vm2, %v2252_v54 }
 0x7b2   :  { %v2149_v55 = vpop.f32.mrb[16].mxu0 }
 0x7b3   :  { %v2150_v56 = vadd.f32 %v2149_v55, %v2078_v31  ;;  %v2810_v28 = vpop.f32.mrb[17].mxu0 }
 0x7b5   :  { %3259 = vtanh.f32 %v2150_v56 }
 0x7bf   :  { %v3260_v57 = vpop.eup %3259 }
 0x7c0   :  { %2834 = vmatmul.mubr.msk.f32.vlgmr.msra.gmra.mrb[18].mxu1 %vm920_vm9, %v3260_v57  ;;  %2859 = vmatmul.mubr.msk.f32.vlgmr.msra.gmra.mrb[18].mxu0 %vm920_vm9, %v3260_v57 }
 0x893   :  { %v2238_v58 = vpop.f32.mrb[18].mxu1  ;;  %v2323_v59 = vpop.f32.mrb[18].mxu0 }
 0x894   :  { %v2324_v60 = vadd.f32 %v2323_v59, %v2253_v3  ;;  %v2835_v61 = vpop.f32.mrb[19].mxu1  ;;  %v2860_v25 = vpop.f32.mrb[19].mxu0  ;;  %v2239_v2 = vadd.f32 %v2238_v58, %v2165_v0 }
 0x896   :  { %v2328_v62 = vmul.f32 0.5, %v2324_v60  ;;  %v2334_v6 = vrot.slane %v2239_v2, 7  ;;  %v2337_v8 = vrot.slane %v2324_v60, 6 }
 0x898   :  { %v2329_v63 = vmul.f32 1.442695, %v2328_v62 }
 0x89a   :  { %3261 = vpow2.f32 %v2329_v63 }
 0x8a4   :  { %v3262_v4 = vpop.eup %3261 }
 0x8a5   :  { %v2331_v5 = vmul.f32 %v3262_v4, %v2327_v1 }
 0x8a7   :  { %v2332_v7 = vadd.f32 %v2331_v5, %v2239_v2 }
 0x8a9   :  { %v2340_v9 = vsel %vm2339_vm0, %v2332_v7, %v2334_v6 }
 0x8aa   :  { %v2341_v10 = vsel %vm1467_vm10, %v2340_v9, %v2337_v8 }
 0x8ab   :  { %2343 = vst.msk [vmem:[%s4540_s18] sm:$0x7] %vm2342_vm1, %v2341_v10 }

</bundles_post_ra>
